<compile_context>
chip_gen: v5e
topology: v5e:2x2
jax: 0.10.0
libtpu: 0.0.40
codegen_flags: <defaults>
</compile_context>

<pallas_src>
import functools

import jax
import jax.numpy as jnp
import numpy as np
from jax.experimental import pallas as pl
from jax.experimental.pallas import tpu as pltpu


# ----------------------------------------------------------------------------
# Pallas kernel
# ----------------------------------------------------------------------------
def _lstm_net_kernel(num_layers, seq_len, hidden, x_ref, *refs):
    """refs = [w_ihT_0(bf16), w_hhT_0(bf16), b_0(f32), ... per layer ...,
               fc_w(f32, PyTorch layout), fc_b(f32), out_ref, hbuf_scratch]"""
    n_param = 3 * num_layers + 2
    param_refs = refs[:n_param]
    out_ref = refs[n_param]
    hbuf_ref = refs[n_param + 1]                       # (T*B, H) f32 inter-layer scratch

    batch = out_ref.shape[0]
    out_dim = out_ref.shape[1]

    h = None
    for layer in range(num_layers):
        w_ihT = param_refs[3 * layer + 0][...]         # (in_l, 4H) bf16
        w_hhT = param_refs[3 * layer + 1][...]         # (H, 4H)    bf16
        bias = param_refs[3 * layer + 2][...]          # (1, 4H)    f32 == b_ih + b_hh

        # Layer input as one t-major (T*B, in_l) slab (x for layer 0, scratch after).
        layer_in = x_ref[...] if layer == 0 else hbuf_ref[...]

        # Hoisted input projection: ONE matmul + ONE bias broadcast for all timesteps.
        xg = jnp.dot(layer_in.astype(jnp.bfloat16), w_ihT,
                     preferred_element_type=jnp.float32) + bias     # (T*B, 4H) f32

        h = jnp.zeros((batch, hidden), jnp.float32)
        c = jnp.zeros((batch, hidden), jnp.float32)
        last_layer = layer == num_layers - 1
        for t in range(seq_len):
            # Only one (dependent) MXU matmul per step on the recurrence chain.
            gates = xg[t * batch:(t + 1) * batch, :] + jnp.dot(
                h.astype(jnp.bfloat16), w_hhT,
                preferred_element_type=jnp.float32)                 # (B, 4H) f32

            # Whole-block (lane-dense) nonlinearities, then 32-lane gate slices.
            sig = jax.nn.sigmoid(gates)
            tnh = jnp.tanh(gates)
            i_g = sig[:, 0 * hidden:1 * hidden]
            f_g = sig[:, 1 * hidden:2 * hidden]
            g_g = tnh[:, 2 * hidden:3 * hidden]
            o_g = sig[:, 3 * hidden:4 * hidden]

            c = f_g * c + i_g * g_g
            h = o_g * jnp.tanh(c)

            if not last_layer:                         # top layer: only final h is needed
                hbuf_ref[t * batch:(t + 1) * batch, :] = h

    # fc(lstm_out[:, -1, :]) then tanh — uses only the final h of the top layer.
    fc_w = param_refs[3 * num_layers + 0][...]         # (out_dim, H) f32 (PyTorch layout)
    fc_b = param_refs[3 * num_layers + 1][...]         # (1, out_dim) f32
    if out_dim == 1:
        # VPU multiply + cross-lane reduce instead of an almost-empty MXU push.
        logits = jnp.sum(h * fc_w, axis=-1, keepdims=True) + fc_b
    else:
        logits = jax.lax.dot_general(h, fc_w, (((1,), (1,)), ((), ())),
                                     preferred_element_type=jnp.float32) + fc_b
    out_ref[...] = jnp.tanh(logits).astype(out_ref.dtype)


# ----------------------------------------------------------------------------
# Wrapper (glue: unsqueeze/squeeze, layout plumbing, weight transposition, pallas_call)
# ----------------------------------------------------------------------------
def lstm_net_forward(x, params, *, hidden, num_layers):
    if x.ndim == 2:                                    # mimic x.unsqueeze(0)
        x = x[None]
    batch, seq_len, in_dim = x.shape

    # (B, T, In) -> t-major (T*B, In) slab; done in plain JAX outside the kernel.
    x2 = jnp.transpose(x, (1, 0, 2)).reshape(seq_len * batch, in_dim).astype(jnp.float32)

    flat = []
    for layer in range(num_layers):
        w_ih, w_hh, b_ih, b_hh = params["lstm"][layer]
        flat += [w_ih.T.astype(jnp.bfloat16),          # (in_l, 4H)  MXU operand -> bf16
                 w_hh.T.astype(jnp.bfloat16),          # (H, 4H)     MXU operand -> bf16
                 (b_ih + b_hh)[None, :].astype(jnp.float32)]
    fc_w, fc_b = params["fc"]
    out_dim = fc_w.shape[0]
    flat += [fc_w.astype(jnp.float32),                 # (out_dim, H) PyTorch layout
             fc_b[None, :].astype(jnp.float32)]

    kernel = functools.partial(_lstm_net_kernel, num_layers, seq_len, hidden)
    out = pl.pallas_call(
        kernel,
        out_shape=jax.ShapeDtypeStruct((batch, out_dim), jnp.float32),
        in_specs=[pl.BlockSpec(memory_space=pltpu.MemorySpace.VMEM)
                  for _ in range(1 + len(flat))],
        out_specs=pl.BlockSpec(memory_space=pltpu.MemorySpace.VMEM),
        scratch_shapes=[pltpu.VMEM((seq_len * batch, hidden), jnp.float32)],
    )(x2, *flat)
    # NOTE: at batch > 2 on v7x, add a batch grid axis with dimension_semantics=
    # ("parallel",) to use the second TensorCore; unnecessary at B=2.

    if out.shape[0] == 1:                              # == PyTorch out.squeeze(0)
        out = out[0]
    return out


# ----------------------------------------------------------------------------
# Deterministic parameter init (shapes match nn.LSTM / nn.Linear)
# ----------------------------------------------------------------------------
def init_params(key, in_dim, hidden, num_layers, out_dim):
    k = 1.0 / np.sqrt(hidden)
    keys = jax.random.split(key, 4 * num_layers + 2)
    idx = 0
    lstm = []
    for layer in range(num_layers):
        in_l = in_dim if layer == 0 else hidden
        w_ih = jax.random.uniform(keys[idx], (4 * hidden, in_l), jnp.float32, -k, k); idx += 1
        w_hh = jax.random.uniform(keys[idx], (4 * hidden, hidden), jnp.float32, -k, k); idx += 1
        b_ih = jax.random.uniform(keys[idx], (4 * hidden,), jnp.float32, -k, k); idx += 1
        b_hh = jax.random.uniform(keys[idx], (4 * hidden,), jnp.float32, -k, k); idx += 1
        lstm.append((w_ih, w_hh, b_ih, b_hh))
    fc_w = jax.random.uniform(keys[idx], (out_dim, hidden), jnp.float32, -k, k); idx += 1
    fc_b = jax.random.uniform(keys[idx], (out_dim,), jnp.float32, -k, k)
    return {"lstm": lstm, "fc": (fc_w, fc_b)}


# ----------------------------------------------------------------------------
# Pure-JAX reference (f32 everywhere) for correctness check
# ----------------------------------------------------------------------------
def reference_forward(x, params, *, hidden, num_layers):
    if x.ndim == 2:
        x = x[None]
    batch, seq_len, _ = x.shape
    layer_in = x
    for layer in range(num_layers):
        w_ih, w_hh, b_ih, b_hh = params["lstm"][layer]
        h = jnp.zeros((batch, hidden), jnp.float32)
        c = jnp.zeros((batch, hidden), jnp.float32)
        outs = []
        for t in range(seq_len):
            gates = layer_in[:, t, :] @ w_ih.T + h @ w_hh.T + b_ih + b_hh
            i_g = jax.nn.sigmoid(gates[:, 0 * hidden:1 * hidden])
            f_g = jax.nn.sigmoid(gates[:, 1 * hidden:2 * hidden])
            g_g = jnp.tanh(gates[:, 2 * hidden:3 * hidden])
            o_g = jax.nn.sigmoid(gates[:, 3 * hidden:4 * hidden])
            c = f_g * c + i_g * g_g
            h = o_g * jnp.tanh(c)
            outs.append(h)
        layer_in = jnp.stack(outs, axis=1)
    fc_w, fc_b = params["fc"]
    out = jnp.tanh(layer_in[:, -1, :] @ fc_w.T + fc_b)
    if out.shape[0] == 1:
        out = out[0]
    return out


# ----------------------------------------------------------------------------
if __name__ == "__main__":
    BATCH, SEQ, IN_DIM, HIDDEN, LAYERS, OUT_DIM = 2, 8, 4, 32, 2, 1

    key = jax.random.PRNGKey(0)
    key_p, key_x = jax.random.split(key)
    params = init_params(key_p, IN_DIM, HIDDEN, LAYERS, OUT_DIM)
    x = jax.random.normal(key_x, (BATCH, SEQ, IN_DIM), jnp.float32)

    out = lstm_net_forward(x, params, hidden=HIDDEN, num_layers=LAYERS)
    out = jax.block_until_ready(out)

    ref = jax.block_until_ready(
        reference_forward(x, params, hidden=HIDDEN, num_layers=LAYERS))
    # bf16 MXU operands (f32 accumulation / gate math) => slightly loosened tolerance.
    if not np.allclose(np.asarray(out), np.asarray(ref), atol=2e-2, rtol=2e-2):
        raise AssertionError("Pallas kernel output mismatch vs JAX reference")

    print("KERNEL_OK")
</pallas_src>

<mosaic_0001>
module attributes {stable_mosaic.version = 11 : i64} {
  func.func @_lstm_net_kernel(%arg0: memref<16x4xf32, #tpu.memory_space<vmem>>, %arg1: memref<4x128xbf16, #tpu.memory_space<vmem>>, %arg2: memref<32x128xbf16, #tpu.memory_space<vmem>>, %arg3: memref<1x128xf32, #tpu.memory_space<vmem>>, %arg4: memref<32x128xbf16, #tpu.memory_space<vmem>>, %arg5: memref<32x128xbf16, #tpu.memory_space<vmem>>, %arg6: memref<1x128xf32, #tpu.memory_space<vmem>>, %arg7: memref<1x32xf32, #tpu.memory_space<vmem>>, %arg8: memref<1x1xf32, #tpu.memory_space<vmem>>, %arg9: memref<2x1xf32, #tpu.memory_space<vmem>>, %arg10: memref<16x32xf32, #tpu.memory_space<vmem>>) attributes {dimension_semantics = [], scalar_prefetch = 0 : i64, scratch_operands = 1 : i64, tpu.core_type = #tpu.core_type<tc>} {
    %c0 = arith.constant 0 : index
    %c0_0 = arith.constant 0 : index
    %0 = vector.load %arg1[%c0, %c0_0] : memref<4x128xbf16, #tpu.memory_space<vmem>>, vector<4x128xbf16>
    %c0_1 = arith.constant 0 : index
    %c0_2 = arith.constant 0 : index
    %1 = vector.load %arg2[%c0_1, %c0_2] : memref<32x128xbf16, #tpu.memory_space<vmem>>, vector<32x128xbf16>
    %c0_3 = arith.constant 0 : index
    %c0_4 = arith.constant 0 : index
    %2 = vector.load %arg3[%c0_3, %c0_4] : memref<1x128xf32, #tpu.memory_space<vmem>>, vector<1x128xf32>
    %c0_5 = arith.constant 0 : index
    %c0_6 = arith.constant 0 : index
    %3 = vector.load %arg0[%c0_5, %c0_6] : memref<16x4xf32, #tpu.memory_space<vmem>>, vector<16x4xf32>
    %4 = arith.truncf %3 : vector<16x4xf32> to vector<16x4xbf16>
    %cst = arith.constant dense<0.000000e+00> : vector<16x128xf32>
    %5 = tpu.matmul %4, %0, %cst {dimension_numbers = #tpu.dot_dimension_numbers<[1], [0], [0], [1], [0, 0, 1, 1], [], []>} : vector<16x4xbf16>, vector<4x128xbf16>, vector<16x128xf32> -> vector<16x128xf32>
    %6 = vector.broadcast %2 : vector<1x128xf32> to vector<16x128xf32>
    %7 = arith.addf %5, %6 : vector<16x128xf32>
    %cst_7 = arith.constant 0.000000e+00 : f32
    %8 = vector.broadcast %cst_7 : f32 to vector<2x32xf32>
    %cst_8 = arith.constant 0.000000e+00 : f32
    %9 = vector.broadcast %cst_8 : f32 to vector<2x32xf32>
    %10 = vector.extract_strided_slice %7 {offsets = [0, 0], sizes = [2, 128], strides = [1, 1]} : vector<16x128xf32> to vector<2x128xf32>
    %11 = arith.truncf %8 : vector<2x32xf32> to vector<2x32xbf16>
    %cst_9 = arith.constant dense<0.000000e+00> : vector<2x128xf32>
    %12 = tpu.matmul %11, %1, %cst_9 {dimension_numbers = #tpu.dot_dimension_numbers<[1], [0], [0], [1], [0, 0, 1, 1], [], []>} : vector<2x32xbf16>, vector<32x128xbf16>, vector<2x128xf32> -> vector<2x128xf32>
    %13 = arith.addf %10, %12 : vector<2x128xf32>
    %14 = arith.negf %13 : vector<2x128xf32>
    %15 = math.exp %14 : vector<2x128xf32>
    %cst_10 = arith.constant 1.000000e+00 : f32
    %16 = vector.broadcast %cst_10 : f32 to vector<2x128xf32>
    %17 = arith.addf %16, %15 : vector<2x128xf32>
    %18 = arith.divf %16, %17 : vector<2x128xf32>
    %19 = math.tanh %13 : vector<2x128xf32>
    %20 = vector.extract_strided_slice %18 {offsets = [0, 0], sizes = [2, 32], strides = [1, 1]} : vector<2x128xf32> to vector<2x32xf32>
    %21 = vector.extract_strided_slice %18 {offsets = [0, 32], sizes = [2, 32], strides = [1, 1]} : vector<2x128xf32> to vector<2x32xf32>
    %22 = vector.extract_strided_slice %19 {offsets = [0, 64], sizes = [2, 32], strides = [1, 1]} : vector<2x128xf32> to vector<2x32xf32>
    %23 = vector.extract_strided_slice %18 {offsets = [0, 96], sizes = [2, 32], strides = [1, 1]} : vector<2x128xf32> to vector<2x32xf32>
    %24 = arith.mulf %21, %9 : vector<2x32xf32>
    %25 = arith.mulf %20, %22 : vector<2x32xf32>
    %26 = arith.addf %24, %25 : vector<2x32xf32>
    %27 = math.tanh %26 : vector<2x32xf32>
    %28 = arith.mulf %23, %27 : vector<2x32xf32>
    %c0_11 = arith.constant 0 : index
    %c0_12 = arith.constant 0 : index
    %29 = vector.load %arg10[%c0_11, %c0_12] : memref<16x32xf32, #tpu.memory_space<vmem>>, vector<2x32xf32>
    tpu.vector_store %arg10[%c0_11, %c0_12], %28 {strides = array<i32>} : memref<16x32xf32, #tpu.memory_space<vmem>>, vector<2x32xf32>,
    %30 = vector.extract_strided_slice %7 {offsets = [2, 0], sizes = [2, 128], strides = [1, 1]} : vector<16x128xf32> to vector<2x128xf32>
    %31 = arith.truncf %28 : vector<2x32xf32> to vector<2x32xbf16>
    %cst_13 = arith.constant dense<0.000000e+00> : vector<2x128xf32>
    %32 = tpu.matmul %31, %1, %cst_13 {dimension_numbers = #tpu.dot_dimension_numbers<[1], [0], [0], [1], [0, 0, 1, 1], [], []>} : vector<2x32xbf16>, vector<32x128xbf16>, vector<2x128xf32> -> vector<2x128xf32>
    %33 = arith.addf %30, %32 : vector<2x128xf32>
    %34 = arith.negf %33 : vector<2x128xf32>
    %35 = math.exp %34 : vector<2x128xf32>
    %cst_14 = arith.constant 1.000000e+00 : f32
    %36 = vector.broadcast %cst_14 : f32 to vector<2x128xf32>
    %37 = arith.addf %36, %35 : vector<2x128xf32>
    %38 = arith.divf %36, %37 : vector<2x128xf32>
    %39 = math.tanh %33 : vector<2x128xf32>
    %40 = vector.extract_strided_slice %38 {offsets = [0, 0], sizes = [2, 32], strides = [1, 1]} : vector<2x128xf32> to vector<2x32xf32>
    %41 = vector.extract_strided_slice %38 {offsets = [0, 32], sizes = [2, 32], strides = [1, 1]} : vector<2x128xf32> to vector<2x32xf32>
    %42 = vector.extract_strided_slice %39 {offsets = [0, 64], sizes = [2, 32], strides = [1, 1]} : vector<2x128xf32> to vector<2x32xf32>
    %43 = vector.extract_strided_slice %38 {offsets = [0, 96], sizes = [2, 32], strides = [1, 1]} : vector<2x128xf32> to vector<2x32xf32>
    %44 = arith.mulf %41, %26 : vector<2x32xf32>
    %45 = arith.mulf %40, %42 : vector<2x32xf32>
    %46 = arith.addf %44, %45 : vector<2x32xf32>
    %47 = math.tanh %46 : vector<2x32xf32>
    %48 = arith.mulf %43, %47 : vector<2x32xf32>
    %c2 = arith.constant 2 : index
    %c0_15 = arith.constant 0 : index
    %49 = vector.load %arg10[%c2, %c0_15] : memref<16x32xf32, #tpu.memory_space<vmem>>, vector<2x32xf32>
    tpu.vector_store %arg10[%c2, %c0_15], %48 {strides = array<i32>} : memref<16x32xf32, #tpu.memory_space<vmem>>, vector<2x32xf32>,
    %50 = vector.extract_strided_slice %7 {offsets = [4, 0], sizes = [2, 128], strides = [1, 1]} : vector<16x128xf32> to vector<2x128xf32>
    %51 = arith.truncf %48 : vector<2x32xf32> to vector<2x32xbf16>
    %cst_16 = arith.constant dense<0.000000e+00> : vector<2x128xf32>
    %52 = tpu.matmul %51, %1, %cst_16 {dimension_numbers = #tpu.dot_dimension_numbers<[1], [0], [0], [1], [0, 0, 1, 1], [], []>} : vector<2x32xbf16>, vector<32x128xbf16>, vector<2x128xf32> -> vector<2x128xf32>
    %53 = arith.addf %50, %52 : vector<2x128xf32>
    %54 = arith.negf %53 : vector<2x128xf32>
    %55 = math.exp %54 : vector<2x128xf32>
    %cst_17 = arith.constant 1.000000e+00 : f32
    %56 = vector.broadcast %cst_17 : f32 to vector<2x128xf32>
    %57 = arith.addf %56, %55 : vector<2x128xf32>
    %58 = arith.divf %56, %57 : vector<2x128xf32>
    %59 = math.tanh %53 : vector<2x128xf32>
    %60 = vector.extract_strided_slice %58 {offsets = [0, 0], sizes = [2, 32], strides = [1, 1]} : vector<2x128xf32> to vector<2x32xf32>
    %61 = vector.extract_strided_slice %58 {offsets = [0, 32], sizes = [2, 32], strides = [1, 1]} : vector<2x128xf32> to vector<2x32xf32>
    %62 = vector.extract_strided_slice %59 {offsets = [0, 64], sizes = [2, 32], strides = [1, 1]} : vector<2x128xf32> to vector<2x32xf32>
    %63 = vector.extract_strided_slice %58 {offsets = [0, 96], sizes = [2, 32], strides = [1, 1]} : vector<2x128xf32> to vector<2x32xf32>
    %64 = arith.mulf %61, %46 : vector<2x32xf32>
    %65 = arith.mulf %60, %62 : vector<2x32xf32>
    %66 = arith.addf %64, %65 : vector<2x32xf32>
    %67 = math.tanh %66 : vector<2x32xf32>
    %68 = arith.mulf %63, %67 : vector<2x32xf32>
    %c4 = arith.constant 4 : index
    %c0_18 = arith.constant 0 : index
    %69 = vector.load %arg10[%c4, %c0_18] : memref<16x32xf32, #tpu.memory_space<vmem>>, vector<2x32xf32>
    tpu.vector_store %arg10[%c4, %c0_18], %68 {strides = array<i32>} : memref<16x32xf32, #tpu.memory_space<vmem>>, vector<2x32xf32>,
    %70 = vector.extract_strided_slice %7 {offsets = [6, 0], sizes = [2, 128], strides = [1, 1]} : vector<16x128xf32> to vector<2x128xf32>
    %71 = arith.truncf %68 : vector<2x32xf32> to vector<2x32xbf16>
    %cst_19 = arith.constant dense<0.000000e+00> : vector<2x128xf32>
    %72 = tpu.matmul %71, %1, %cst_19 {dimension_numbers = #tpu.dot_dimension_numbers<[1], [0], [0], [1], [0, 0, 1, 1], [], []>} : vector<2x32xbf16>, vector<32x128xbf16>, vector<2x128xf32> -> vector<2x128xf32>
    %73 = arith.addf %70, %72 : vector<2x128xf32>
    %74 = arith.negf %73 : vector<2x128xf32>
    %75 = math.exp %74 : vector<2x128xf32>
    %cst_20 = arith.constant 1.000000e+00 : f32
    %76 = vector.broadcast %cst_20 : f32 to vector<2x128xf32>
    %77 = arith.addf %76, %75 : vector<2x128xf32>
    %78 = arith.divf %76, %77 : vector<2x128xf32>
    %79 = math.tanh %73 : vector<2x128xf32>
    %80 = vector.extract_strided_slice %78 {offsets = [0, 0], sizes = [2, 32], strides = [1, 1]} : vector<2x128xf32> to vector<2x32xf32>
    %81 = vector.extract_strided_slice %78 {offsets = [0, 32], sizes = [2, 32], strides = [1, 1]} : vector<2x128xf32> to vector<2x32xf32>
    %82 = vector.extract_strided_slice %79 {offsets = [0, 64], sizes = [2, 32], strides = [1, 1]} : vector<2x128xf32> to vector<2x32xf32>
    %83 = vector.extract_strided_slice %78 {offsets = [0, 96], sizes = [2, 32], strides = [1, 1]} : vector<2x128xf32> to vector<2x32xf32>
    %84 = arith.mulf %81, %66 : vector<2x32xf32>
    %85 = arith.mulf %80, %82 : vector<2x32xf32>
    %86 = arith.addf %84, %85 : vector<2x32xf32>
    %87 = math.tanh %86 : vector<2x32xf32>
    %88 = arith.mulf %83, %87 : vector<2x32xf32>
    %c6 = arith.constant 6 : index
    %c0_21 = arith.constant 0 : index
    %89 = vector.load %arg10[%c6, %c0_21] : memref<16x32xf32, #tpu.memory_space<vmem>>, vector<2x32xf32>
    tpu.vector_store %arg10[%c6, %c0_21], %88 {strides = array<i32>} : memref<16x32xf32, #tpu.memory_space<vmem>>, vector<2x32xf32>,
    %90 = vector.extract_strided_slice %7 {offsets = [8, 0], sizes = [2, 128], strides = [1, 1]} : vector<16x128xf32> to vector<2x128xf32>
    %91 = arith.truncf %88 : vector<2x32xf32> to vector<2x32xbf16>
    %cst_22 = arith.constant dense<0.000000e+00> : vector<2x128xf32>
    %92 = tpu.matmul %91, %1, %cst_22 {dimension_numbers = #tpu.dot_dimension_numbers<[1], [0], [0], [1], [0, 0, 1, 1], [], []>} : vector<2x32xbf16>, vector<32x128xbf16>, vector<2x128xf32> -> vector<2x128xf32>
    %93 = arith.addf %90, %92 : vector<2x128xf32>
    %94 = arith.negf %93 : vector<2x128xf32>
    %95 = math.exp %94 : vector<2x128xf32>
    %cst_23 = arith.constant 1.000000e+00 : f32
    %96 = vector.broadcast %cst_23 : f32 to vector<2x128xf32>
    %97 = arith.addf %96, %95 : vector<2x128xf32>
    %98 = arith.divf %96, %97 : vector<2x128xf32>
    %99 = math.tanh %93 : vector<2x128xf32>
    %100 = vector.extract_strided_slice %98 {offsets = [0, 0], sizes = [2, 32], strides = [1, 1]} : vector<2x128xf32> to vector<2x32xf32>
    %101 = vector.extract_strided_slice %98 {offsets = [0, 32], sizes = [2, 32], strides = [1, 1]} : vector<2x128xf32> to vector<2x32xf32>
    %102 = vector.extract_strided_slice %99 {offsets = [0, 64], sizes = [2, 32], strides = [1, 1]} : vector<2x128xf32> to vector<2x32xf32>
    %103 = vector.extract_strided_slice %98 {offsets = [0, 96], sizes = [2, 32], strides = [1, 1]} : vector<2x128xf32> to vector<2x32xf32>
    %104 = arith.mulf %101, %86 : vector<2x32xf32>
    %105 = arith.mulf %100, %102 : vector<2x32xf32>
    %106 = arith.addf %104, %105 : vector<2x32xf32>
    %107 = math.tanh %106 : vector<2x32xf32>
    %108 = arith.mulf %103, %107 : vector<2x32xf32>
    %c8 = arith.constant 8 : index
    %c0_24 = arith.constant 0 : index
    %109 = vector.load %arg10[%c8, %c0_24] : memref<16x32xf32, #tpu.memory_space<vmem>>, vector<2x32xf32>
    tpu.vector_store %arg10[%c8, %c0_24], %108 {strides = array<i32>} : memref<16x32xf32, #tpu.memory_space<vmem>>, vector<2x32xf32>,
    %110 = vector.extract_strided_slice %7 {offsets = [10, 0], sizes = [2, 128], strides = [1, 1]} : vector<16x128xf32> to vector<2x128xf32>
    %111 = arith.truncf %108 : vector<2x32xf32> to vector<2x32xbf16>
    %cst_25 = arith.constant dense<0.000000e+00> : vector<2x128xf32>
    %112 = tpu.matmul %111, %1, %cst_25 {dimension_numbers = #tpu.dot_dimension_numbers<[1], [0], [0], [1], [0, 0, 1, 1], [], []>} : vector<2x32xbf16>, vector<32x128xbf16>, vector<2x128xf32> -> vector<2x128xf32>
    %113 = arith.addf %110, %112 : vector<2x128xf32>
    %114 = arith.negf %113 : vector<2x128xf32>
    %115 = math.exp %114 : vector<2x128xf32>
    %cst_26 = arith.constant 1.000000e+00 : f32
    %116 = vector.broadcast %cst_26 : f32 to vector<2x128xf32>
    %117 = arith.addf %116, %115 : vector<2x128xf32>
    %118 = arith.divf %116, %117 : vector<2x128xf32>
    %119 = math.tanh %113 : vector<2x128xf32>
    %120 = vector.extract_strided_slice %118 {offsets = [0, 0], sizes = [2, 32], strides = [1, 1]} : vector<2x128xf32> to vector<2x32xf32>
    %121 = vector.extract_strided_slice %118 {offsets = [0, 32], sizes = [2, 32], strides = [1, 1]} : vector<2x128xf32> to vector<2x32xf32>
    %122 = vector.extract_strided_slice %119 {offsets = [0, 64], sizes = [2, 32], strides = [1, 1]} : vector<2x128xf32> to vector<2x32xf32>
    %123 = vector.extract_strided_slice %118 {offsets = [0, 96], sizes = [2, 32], strides = [1, 1]} : vector<2x128xf32> to vector<2x32xf32>
    %124 = arith.mulf %121, %106 : vector<2x32xf32>
    %125 = arith.mulf %120, %122 : vector<2x32xf32>
    %126 = arith.addf %124, %125 : vector<2x32xf32>
    %127 = math.tanh %126 : vector<2x32xf32>
    %128 = arith.mulf %123, %127 : vector<2x32xf32>
    %c10 = arith.constant 10 : index
    %c0_27 = arith.constant 0 : index
    %129 = vector.load %arg10[%c10, %c0_27] : memref<16x32xf32, #tpu.memory_space<vmem>>, vector<2x32xf32>
    tpu.vector_store %arg10[%c10, %c0_27], %128 {strides = array<i32>} : memref<16x32xf32, #tpu.memory_space<vmem>>, vector<2x32xf32>,
    %130 = vector.extract_strided_slice %7 {offsets = [12, 0], sizes = [2, 128], strides = [1, 1]} : vector<16x128xf32> to vector<2x128xf32>
    %131 = arith.truncf %128 : vector<2x32xf32> to vector<2x32xbf16>
    %cst_28 = arith.constant dense<0.000000e+00> : vector<2x128xf32>
    %132 = tpu.matmul %131, %1, %cst_28 {dimension_numbers = #tpu.dot_dimension_numbers<[1], [0], [0], [1], [0, 0, 1, 1], [], []>} : vector<2x32xbf16>, vector<32x128xbf16>, vector<2x128xf32> -> vector<2x128xf32>
    %133 = arith.addf %130, %132 : vector<2x128xf32>
    %134 = arith.negf %133 : vector<2x128xf32>
    %135 = math.exp %134 : vector<2x128xf32>
    %cst_29 = arith.constant 1.000000e+00 : f32
    %136 = vector.broadcast %cst_29 : f32 to vector<2x128xf32>
    %137 = arith.addf %136, %135 : vector<2x128xf32>
    %138 = arith.divf %136, %137 : vector<2x128xf32>
    %139 = math.tanh %133 : vector<2x128xf32>
    %140 = vector.extract_strided_slice %138 {offsets = [0, 0], sizes = [2, 32], strides = [1, 1]} : vector<2x128xf32> to vector<2x32xf32>
    %141 = vector.extract_strided_slice %138 {offsets = [0, 32], sizes = [2, 32], strides = [1, 1]} : vector<2x128xf32> to vector<2x32xf32>
    %142 = vector.extract_strided_slice %139 {offsets = [0, 64], sizes = [2, 32], strides = [1, 1]} : vector<2x128xf32> to vector<2x32xf32>
    %143 = vector.extract_strided_slice %138 {offsets = [0, 96], sizes = [2, 32], strides = [1, 1]} : vector<2x128xf32> to vector<2x32xf32>
    %144 = arith.mulf %141, %126 : vector<2x32xf32>
    %145 = arith.mulf %140, %142 : vector<2x32xf32>
    %146 = arith.addf %144, %145 : vector<2x32xf32>
    %147 = math.tanh %146 : vector<2x32xf32>
    %148 = arith.mulf %143, %147 : vector<2x32xf32>
    %c12 = arith.constant 12 : index
    %c0_30 = arith.constant 0 : index
    %149 = vector.load %arg10[%c12, %c0_30] : memref<16x32xf32, #tpu.memory_space<vmem>>, vector<2x32xf32>
    tpu.vector_store %arg10[%c12, %c0_30], %148 {strides = array<i32>} : memref<16x32xf32, #tpu.memory_space<vmem>>, vector<2x32xf32>,
    %150 = vector.extract_strided_slice %7 {offsets = [14, 0], sizes = [2, 128], strides = [1, 1]} : vector<16x128xf32> to vector<2x128xf32>
    %151 = arith.truncf %148 : vector<2x32xf32> to vector<2x32xbf16>
    %cst_31 = arith.constant dense<0.000000e+00> : vector<2x128xf32>
    %152 = tpu.matmul %151, %1, %cst_31 {dimension_numbers = #tpu.dot_dimension_numbers<[1], [0], [0], [1], [0, 0, 1, 1], [], []>} : vector<2x32xbf16>, vector<32x128xbf16>, vector<2x128xf32> -> vector<2x128xf32>
    %153 = arith.addf %150, %152 : vector<2x128xf32>
    %154 = arith.negf %153 : vector<2x128xf32>
    %155 = math.exp %154 : vector<2x128xf32>
    %cst_32 = arith.constant 1.000000e+00 : f32
    %156 = vector.broadcast %cst_32 : f32 to vector<2x128xf32>
    %157 = arith.addf %156, %155 : vector<2x128xf32>
    %158 = arith.divf %156, %157 : vector<2x128xf32>
    %159 = math.tanh %153 : vector<2x128xf32>
    %160 = vector.extract_strided_slice %158 {offsets = [0, 0], sizes = [2, 32], strides = [1, 1]} : vector<2x128xf32> to vector<2x32xf32>
    %161 = vector.extract_strided_slice %158 {offsets = [0, 32], sizes = [2, 32], strides = [1, 1]} : vector<2x128xf32> to vector<2x32xf32>
    %162 = vector.extract_strided_slice %159 {offsets = [0, 64], sizes = [2, 32], strides = [1, 1]} : vector<2x128xf32> to vector<2x32xf32>
    %163 = vector.extract_strided_slice %158 {offsets = [0, 96], sizes = [2, 32], strides = [1, 1]} : vector<2x128xf32> to vector<2x32xf32>
    %164 = arith.mulf %161, %146 : vector<2x32xf32>
    %165 = arith.mulf %160, %162 : vector<2x32xf32>
    %166 = arith.addf %164, %165 : vector<2x32xf32>
    %167 = math.tanh %166 : vector<2x32xf32>
    %168 = arith.mulf %163, %167 : vector<2x32xf32>
    %c14 = arith.constant 14 : index
    %c0_33 = arith.constant 0 : index
    %169 = vector.load %arg10[%c14, %c0_33] : memref<16x32xf32, #tpu.memory_space<vmem>>, vector<2x32xf32>
    tpu.vector_store %arg10[%c14, %c0_33], %168 {strides = array<i32>} : memref<16x32xf32, #tpu.memory_space<vmem>>, vector<2x32xf32>,
    %c0_34 = arith.constant 0 : index
    %c0_35 = arith.constant 0 : index
    %170 = vector.load %arg4[%c0_34, %c0_35] : memref<32x128xbf16, #tpu.memory_space<vmem>>, vector<32x128xbf16>
    %c0_36 = arith.constant 0 : index
    %c0_37 = arith.constant 0 : index
    %171 = vector.load %arg5[%c0_36, %c0_37] : memref<32x128xbf16, #tpu.memory_space<vmem>>, vector<32x128xbf16>
    %c0_38 = arith.constant 0 : index
    %c0_39 = arith.constant 0 : index
    %172 = vector.load %arg6[%c0_38, %c0_39] : memref<1x128xf32, #tpu.memory_space<vmem>>, vector<1x128xf32>
    %c0_40 = arith.constant 0 : index
    %c0_41 = arith.constant 0 : index
    %173 = vector.load %arg10[%c0_40, %c0_41] : memref<16x32xf32, #tpu.memory_space<vmem>>, vector<16x32xf32>
    %174 = arith.truncf %173 : vector<16x32xf32> to vector<16x32xbf16>
    %cst_42 = arith.constant dense<0.000000e+00> : vector<16x128xf32>
    %175 = tpu.matmul %174, %170, %cst_42 {dimension_numbers = #tpu.dot_dimension_numbers<[1], [0], [0], [1], [0, 0, 1, 1], [], []>} : vector<16x32xbf16>, vector<32x128xbf16>, vector<16x128xf32> -> vector<16x128xf32>
    %176 = vector.broadcast %172 : vector<1x128xf32> to vector<16x128xf32>
    %177 = arith.addf %175, %176 : vector<16x128xf32>
    %cst_43 = arith.constant 0.000000e+00 : f32
    %178 = vector.broadcast %cst_43 : f32 to vector<2x32xf32>
    %cst_44 = arith.constant 0.000000e+00 : f32
    %179 = vector.broadcast %cst_44 : f32 to vector<2x32xf32>
    %180 = vector.extract_strided_slice %177 {offsets = [0, 0], sizes = [2, 128], strides = [1, 1]} : vector<16x128xf32> to vector<2x128xf32>
    %181 = arith.truncf %178 : vector<2x32xf32> to vector<2x32xbf16>
    %cst_45 = arith.constant dense<0.000000e+00> : vector<2x128xf32>
    %182 = tpu.matmul %181, %171, %cst_45 {dimension_numbers = #tpu.dot_dimension_numbers<[1], [0], [0], [1], [0, 0, 1, 1], [], []>} : vector<2x32xbf16>, vector<32x128xbf16>, vector<2x128xf32> -> vector<2x128xf32>
    %183 = arith.addf %180, %182 : vector<2x128xf32>
    %184 = arith.negf %183 : vector<2x128xf32>
    %185 = math.exp %184 : vector<2x128xf32>
    %cst_46 = arith.constant 1.000000e+00 : f32
    %186 = vector.broadcast %cst_46 : f32 to vector<2x128xf32>
    %187 = arith.addf %186, %185 : vector<2x128xf32>
    %188 = arith.divf %186, %187 : vector<2x128xf32>
    %189 = math.tanh %183 : vector<2x128xf32>
    %190 = vector.extract_strided_slice %188 {offsets = [0, 0], sizes = [2, 32], strides = [1, 1]} : vector<2x128xf32> to vector<2x32xf32>
    %191 = vector.extract_strided_slice %188 {offsets = [0, 32], sizes = [2, 32], strides = [1, 1]} : vector<2x128xf32> to vector<2x32xf32>
    %192 = vector.extract_strided_slice %189 {offsets = [0, 64], sizes = [2, 32], strides = [1, 1]} : vector<2x128xf32> to vector<2x32xf32>
    %193 = vector.extract_strided_slice %188 {offsets = [0, 96], sizes = [2, 32], strides = [1, 1]} : vector<2x128xf32> to vector<2x32xf32>
    %194 = arith.mulf %191, %179 : vector<2x32xf32>
    %195 = arith.mulf %190, %192 : vector<2x32xf32>
    %196 = arith.addf %194, %195 : vector<2x32xf32>
    %197 = math.tanh %196 : vector<2x32xf32>
    %198 = arith.mulf %193, %197 : vector<2x32xf32>
    %199 = vector.extract_strided_slice %177 {offsets = [2, 0], sizes = [2, 128], strides = [1, 1]} : vector<16x128xf32> to vector<2x128xf32>
    %200 = arith.truncf %198 : vector<2x32xf32> to vector<2x32xbf16>
    %cst_47 = arith.constant dense<0.000000e+00> : vector<2x128xf32>
    %201 = tpu.matmul %200, %171, %cst_47 {dimension_numbers = #tpu.dot_dimension_numbers<[1], [0], [0], [1], [0, 0, 1, 1], [], []>} : vector<2x32xbf16>, vector<32x128xbf16>, vector<2x128xf32> -> vector<2x128xf32>
    %202 = arith.addf %199, %201 : vector<2x128xf32>
    %203 = arith.negf %202 : vector<2x128xf32>
    %204 = math.exp %203 : vector<2x128xf32>
    %cst_48 = arith.constant 1.000000e+00 : f32
    %205 = vector.broadcast %cst_48 : f32 to vector<2x128xf32>
    %206 = arith.addf %205, %204 : vector<2x128xf32>
    %207 = arith.divf %205, %206 : vector<2x128xf32>
    %208 = math.tanh %202 : vector<2x128xf32>
    %209 = vector.extract_strided_slice %207 {offsets = [0, 0], sizes = [2, 32], strides = [1, 1]} : vector<2x128xf32> to vector<2x32xf32>
    %210 = vector.extract_strided_slice %207 {offsets = [0, 32], sizes = [2, 32], strides = [1, 1]} : vector<2x128xf32> to vector<2x32xf32>
    %211 = vector.extract_strided_slice %208 {offsets = [0, 64], sizes = [2, 32], strides = [1, 1]} : vector<2x128xf32> to vector<2x32xf32>
    %212 = vector.extract_strided_slice %207 {offsets = [0, 96], sizes = [2, 32], strides = [1, 1]} : vector<2x128xf32> to vector<2x32xf32>
    %213 = arith.mulf %210, %196 : vector<2x32xf32>
    %214 = arith.mulf %209, %211 : vector<2x32xf32>
    %215 = arith.addf %213, %214 : vector<2x32xf32>
    %216 = math.tanh %215 : vector<2x32xf32>
    %217 = arith.mulf %212, %216 : vector<2x32xf32>
    %218 = vector.extract_strided_slice %177 {offsets = [4, 0], sizes = [2, 128], strides = [1, 1]} : vector<16x128xf32> to vector<2x128xf32>
    %219 = arith.truncf %217 : vector<2x32xf32> to vector<2x32xbf16>
    %cst_49 = arith.constant dense<0.000000e+00> : vector<2x128xf32>
    %220 = tpu.matmul %219, %171, %cst_49 {dimension_numbers = #tpu.dot_dimension_numbers<[1], [0], [0], [1], [0, 0, 1, 1], [], []>} : vector<2x32xbf16>, vector<32x128xbf16>, vector<2x128xf32> -> vector<2x128xf32>
    %221 = arith.addf %218, %220 : vector<2x128xf32>
    %222 = arith.negf %221 : vector<2x128xf32>
    %223 = math.exp %222 : vector<2x128xf32>
    %cst_50 = arith.constant 1.000000e+00 : f32
    %224 = vector.broadcast %cst_50 : f32 to vector<2x128xf32>
    %225 = arith.addf %224, %223 : vector<2x128xf32>
    %226 = arith.divf %224, %225 : vector<2x128xf32>
    %227 = math.tanh %221 : vector<2x128xf32>
    %228 = vector.extract_strided_slice %226 {offsets = [0, 0], sizes = [2, 32], strides = [1, 1]} : vector<2x128xf32> to vector<2x32xf32>
    %229 = vector.extract_strided_slice %226 {offsets = [0, 32], sizes = [2, 32], strides = [1, 1]} : vector<2x128xf32> to vector<2x32xf32>
    %230 = vector.extract_strided_slice %227 {offsets = [0, 64], sizes = [2, 32], strides = [1, 1]} : vector<2x128xf32> to vector<2x32xf32>
    %231 = vector.extract_strided_slice %226 {offsets = [0, 96], sizes = [2, 32], strides = [1, 1]} : vector<2x128xf32> to vector<2x32xf32>
    %232 = arith.mulf %229, %215 : vector<2x32xf32>
    %233 = arith.mulf %228, %230 : vector<2x32xf32>
    %234 = arith.addf %232, %233 : vector<2x32xf32>
    %235 = math.tanh %234 : vector<2x32xf32>
    %236 = arith.mulf %231, %235 : vector<2x32xf32>
    %237 = vector.extract_strided_slice %177 {offsets = [6, 0], sizes = [2, 128], strides = [1, 1]} : vector<16x128xf32> to vector<2x128xf32>
    %238 = arith.truncf %236 : vector<2x32xf32> to vector<2x32xbf16>
    %cst_51 = arith.constant dense<0.000000e+00> : vector<2x128xf32>
    %239 = tpu.matmul %238, %171, %cst_51 {dimension_numbers = #tpu.dot_dimension_numbers<[1], [0], [0], [1], [0, 0, 1, 1], [], []>} : vector<2x32xbf16>, vector<32x128xbf16>, vector<2x128xf32> -> vector<2x128xf32>
    %240 = arith.addf %237, %239 : vector<2x128xf32>
    %241 = arith.negf %240 : vector<2x128xf32>
    %242 = math.exp %241 : vector<2x128xf32>
    %cst_52 = arith.constant 1.000000e+00 : f32
    %243 = vector.broadcast %cst_52 : f32 to vector<2x128xf32>
    %244 = arith.addf %243, %242 : vector<2x128xf32>
    %245 = arith.divf %243, %244 : vector<2x128xf32>
    %246 = math.tanh %240 : vector<2x128xf32>
    %247 = vector.extract_strided_slice %245 {offsets = [0, 0], sizes = [2, 32], strides = [1, 1]} : vector<2x128xf32> to vector<2x32xf32>
    %248 = vector.extract_strided_slice %245 {offsets = [0, 32], sizes = [2, 32], strides = [1, 1]} : vector<2x128xf32> to vector<2x32xf32>
    %249 = vector.extract_strided_slice %246 {offsets = [0, 64], sizes = [2, 32], strides = [1, 1]} : vector<2x128xf32> to vector<2x32xf32>
    %250 = vector.extract_strided_slice %245 {offsets = [0, 96], sizes = [2, 32], strides = [1, 1]} : vector<2x128xf32> to vector<2x32xf32>
    %251 = arith.mulf %248, %234 : vector<2x32xf32>
    %252 = arith.mulf %247, %249 : vector<2x32xf32>
    %253 = arith.addf %251, %252 : vector<2x32xf32>
    %254 = math.tanh %253 : vector<2x32xf32>
    %255 = arith.mulf %250, %254 : vector<2x32xf32>
    %256 = vector.extract_strided_slice %177 {offsets = [8, 0], sizes = [2, 128], strides = [1, 1]} : vector<16x128xf32> to vector<2x128xf32>
    %257 = arith.truncf %255 : vector<2x32xf32> to vector<2x32xbf16>
    %cst_53 = arith.constant dense<0.000000e+00> : vector<2x128xf32>
    %258 = tpu.matmul %257, %171, %cst_53 {dimension_numbers = #tpu.dot_dimension_numbers<[1], [0], [0], [1], [0, 0, 1, 1], [], []>} : vector<2x32xbf16>, vector<32x128xbf16>, vector<2x128xf32> -> vector<2x128xf32>
    %259 = arith.addf %256, %258 : vector<2x128xf32>
    %260 = arith.negf %259 : vector<2x128xf32>
    %261 = math.exp %260 : vector<2x128xf32>
    %cst_54 = arith.constant 1.000000e+00 : f32
    %262 = vector.broadcast %cst_54 : f32 to vector<2x128xf32>
    %263 = arith.addf %262, %261 : vector<2x128xf32>
    %264 = arith.divf %262, %263 : vector<2x128xf32>
    %265 = math.tanh %259 : vector<2x128xf32>
    %266 = vector.extract_strided_slice %264 {offsets = [0, 0], sizes = [2, 32], strides = [1, 1]} : vector<2x128xf32> to vector<2x32xf32>
    %267 = vector.extract_strided_slice %264 {offsets = [0, 32], sizes = [2, 32], strides = [1, 1]} : vector<2x128xf32> to vector<2x32xf32>
    %268 = vector.extract_strided_slice %265 {offsets = [0, 64], sizes = [2, 32], strides = [1, 1]} : vector<2x128xf32> to vector<2x32xf32>
    %269 = vector.extract_strided_slice %264 {offsets = [0, 96], sizes = [2, 32], strides = [1, 1]} : vector<2x128xf32> to vector<2x32xf32>
    %270 = arith.mulf %267, %253 : vector<2x32xf32>
    %271 = arith.mulf %266, %268 : vector<2x32xf32>
    %272 = arith.addf %270, %271 : vector<2x32xf32>
    %273 = math.tanh %272 : vector<2x32xf32>
    %274 = arith.mulf %269, %273 : vector<2x32xf32>
    %275 = vector.extract_strided_slice %177 {offsets = [10, 0], sizes = [2, 128], strides = [1, 1]} : vector<16x128xf32> to vector<2x128xf32>
    %276 = arith.truncf %274 : vector<2x32xf32> to vector<2x32xbf16>
    %cst_55 = arith.constant dense<0.000000e+00> : vector<2x128xf32>
    %277 = tpu.matmul %276, %171, %cst_55 {dimension_numbers = #tpu.dot_dimension_numbers<[1], [0], [0], [1], [0, 0, 1, 1], [], []>} : vector<2x32xbf16>, vector<32x128xbf16>, vector<2x128xf32> -> vector<2x128xf32>
    %278 = arith.addf %275, %277 : vector<2x128xf32>
    %279 = arith.negf %278 : vector<2x128xf32>
    %280 = math.exp %279 : vector<2x128xf32>
    %cst_56 = arith.constant 1.000000e+00 : f32
    %281 = vector.broadcast %cst_56 : f32 to vector<2x128xf32>
    %282 = arith.addf %281, %280 : vector<2x128xf32>
    %283 = arith.divf %281, %282 : vector<2x128xf32>
    %284 = math.tanh %278 : vector<2x128xf32>
    %285 = vector.extract_strided_slice %283 {offsets = [0, 0], sizes = [2, 32], strides = [1, 1]} : vector<2x128xf32> to vector<2x32xf32>
    %286 = vector.extract_strided_slice %283 {offsets = [0, 32], sizes = [2, 32], strides = [1, 1]} : vector<2x128xf32> to vector<2x32xf32>
    %287 = vector.extract_strided_slice %284 {offsets = [0, 64], sizes = [2, 32], strides = [1, 1]} : vector<2x128xf32> to vector<2x32xf32>
    %288 = vector.extract_strided_slice %283 {offsets = [0, 96], sizes = [2, 32], strides = [1, 1]} : vector<2x128xf32> to vector<2x32xf32>
    %289 = arith.mulf %286, %272 : vector<2x32xf32>
    %290 = arith.mulf %285, %287 : vector<2x32xf32>
    %291 = arith.addf %289, %290 : vector<2x32xf32>
    %292 = math.tanh %291 : vector<2x32xf32>
    %293 = arith.mulf %288, %292 : vector<2x32xf32>
    %294 = vector.extract_strided_slice %177 {offsets = [12, 0], sizes = [2, 128], strides = [1, 1]} : vector<16x128xf32> to vector<2x128xf32>
    %295 = arith.truncf %293 : vector<2x32xf32> to vector<2x32xbf16>
    %cst_57 = arith.constant dense<0.000000e+00> : vector<2x128xf32>
    %296 = tpu.matmul %295, %171, %cst_57 {dimension_numbers = #tpu.dot_dimension_numbers<[1], [0], [0], [1], [0, 0, 1, 1], [], []>} : vector<2x32xbf16>, vector<32x128xbf16>, vector<2x128xf32> -> vector<2x128xf32>
    %297 = arith.addf %294, %296 : vector<2x128xf32>
    %298 = arith.negf %297 : vector<2x128xf32>
    %299 = math.exp %298 : vector<2x128xf32>
    %cst_58 = arith.constant 1.000000e+00 : f32
    %300 = vector.broadcast %cst_58 : f32 to vector<2x128xf32>
    %301 = arith.addf %300, %299 : vector<2x128xf32>
    %302 = arith.divf %300, %301 : vector<2x128xf32>
    %303 = math.tanh %297 : vector<2x128xf32>
    %304 = vector.extract_strided_slice %302 {offsets = [0, 0], sizes = [2, 32], strides = [1, 1]} : vector<2x128xf32> to vector<2x32xf32>
    %305 = vector.extract_strided_slice %302 {offsets = [0, 32], sizes = [2, 32], strides = [1, 1]} : vector<2x128xf32> to vector<2x32xf32>
    %306 = vector.extract_strided_slice %303 {offsets = [0, 64], sizes = [2, 32], strides = [1, 1]} : vector<2x128xf32> to vector<2x32xf32>
    %307 = vector.extract_strided_slice %302 {offsets = [0, 96], sizes = [2, 32], strides = [1, 1]} : vector<2x128xf32> to vector<2x32xf32>
    %308 = arith.mulf %305, %291 : vector<2x32xf32>
    %309 = arith.mulf %304, %306 : vector<2x32xf32>
    %310 = arith.addf %308, %309 : vector<2x32xf32>
    %311 = math.tanh %310 : vector<2x32xf32>
    %312 = arith.mulf %307, %311 : vector<2x32xf32>
    %313 = vector.extract_strided_slice %177 {offsets = [14, 0], sizes = [2, 128], strides = [1, 1]} : vector<16x128xf32> to vector<2x128xf32>
    %314 = arith.truncf %312 : vector<2x32xf32> to vector<2x32xbf16>
    %cst_59 = arith.constant dense<0.000000e+00> : vector<2x128xf32>
    %315 = tpu.matmul %314, %171, %cst_59 {dimension_numbers = #tpu.dot_dimension_numbers<[1], [0], [0], [1], [0, 0, 1, 1], [], []>} : vector<2x32xbf16>, vector<32x128xbf16>, vector<2x128xf32> -> vector<2x128xf32>
    %316 = arith.addf %313, %315 : vector<2x128xf32>
    %317 = arith.negf %316 : vector<2x128xf32>
    %318 = math.exp %317 : vector<2x128xf32>
    %cst_60 = arith.constant 1.000000e+00 : f32
    %319 = vector.broadcast %cst_60 : f32 to vector<2x128xf32>
    %320 = arith.addf %319, %318 : vector<2x128xf32>
    %321 = arith.divf %319, %320 : vector<2x128xf32>
    %322 = math.tanh %316 : vector<2x128xf32>
    %323 = vector.extract_strided_slice %321 {offsets = [0, 0], sizes = [2, 32], strides = [1, 1]} : vector<2x128xf32> to vector<2x32xf32>
    %324 = vector.extract_strided_slice %321 {offsets = [0, 32], sizes = [2, 32], strides = [1, 1]} : vector<2x128xf32> to vector<2x32xf32>
    %325 = vector.extract_strided_slice %322 {offsets = [0, 64], sizes = [2, 32], strides = [1, 1]} : vector<2x128xf32> to vector<2x32xf32>
    %326 = vector.extract_strided_slice %321 {offsets = [0, 96], sizes = [2, 32], strides = [1, 1]} : vector<2x128xf32> to vector<2x32xf32>
    %327 = arith.mulf %324, %310 : vector<2x32xf32>
    %328 = arith.mulf %323, %325 : vector<2x32xf32>
    %329 = arith.addf %327, %328 : vector<2x32xf32>
    %330 = math.tanh %329 : vector<2x32xf32>
    %331 = arith.mulf %326, %330 : vector<2x32xf32>
    %c0_61 = arith.constant 0 : index
    %c0_62 = arith.constant 0 : index
    %332 = vector.load %arg7[%c0_61, %c0_62] : memref<1x32xf32, #tpu.memory_space<vmem>>, vector<1x32xf32>
    %c0_63 = arith.constant 0 : index
    %c0_64 = arith.constant 0 : index
    %333 = vector.load %arg8[%c0_63, %c0_64] : memref<1x1xf32, #tpu.memory_space<vmem>>, vector<1x1xf32>
    %334 = vector.broadcast %332 : vector<1x32xf32> to vector<2x32xf32>
    %335 = arith.mulf %331, %334 : vector<2x32xf32>
    %cst_65 = arith.constant dense<0.000000e+00> : vector<2xf32>
    %336 = vector.multi_reduction <add>, %335, %cst_65 [1] : vector<2x32xf32> to vector<2xf32>
    %337 = vector.shape_cast %336 : vector<2xf32> to vector<2x1xf32>
    %338 = vector.broadcast %333 : vector<1x1xf32> to vector<2x1xf32>
    %339 = arith.addf %337, %338 : vector<2x1xf32>
    %340 = math.tanh %339 : vector<2x1xf32>
    %c0_66 = arith.constant 0 : index
    %c0_67 = arith.constant 0 : index
    %341 = vector.load %arg9[%c0_66, %c0_67] : memref<2x1xf32, #tpu.memory_space<vmem>>, vector<2x1xf32>
    tpu.vector_store %arg9[%c0_66, %c0_67], %340 {strides = array<i32>} : memref<2x1xf32, #tpu.memory_space<vmem>>, vector<2x1xf32>,
    return
  }
}

</mosaic_0001>

<bundles_post_ra>
// kernel: tpu_custom_call.1
= control target key start
LH: loop header
LB: loop body
LE: loop exit
PB: predicated region body
PF: predicated region fallthrough
CT: control target
= control target key end

     0   :  { %s1758_s0 = inlined_call_operand.vmem [shape: f32[16,4], index: 0, kind: input, shape index: {}]   ;;  %s1759_s1 = inlined_call_operand.vmem [shape: bf16[4,128], index: 1, kind: input, shape index: {}]   ;;  %s1760_s2 = inlined_call_operand.vmem [shape: bf16[32,128], index: 2, kind: input, shape index: {}]   ;;  %s1761_s3 = inlined_call_operand.vmem [shape: f32[1,128], index: 3, kind: input, shape index: {}]   ;;  %s1762_s4 = inlined_call_operand.hbm [shape: bf16[32,128], index: 4, kind: input, shape index: {}]   ;;  %s1763_s5 = inlined_call_operand.hbm [shape: bf16[32,128], index: 5, kind: input, shape index: {}]   ;;  %s1764_s6 = inlined_call_operand.vmem [shape: f32[1,128], index: 6, kind: input, shape index: {}]   ;;  %s1765_s7 = inlined_call_operand.vmem [shape: f32[1,32], index: 7, kind: input, shape index: {}]   ;;  %s1766_s8 = inlined_call_operand.<no memory space> [shape: f32[1,1], index: 8, kind: input, shape index: {}]   ;;  %s1767_s9 = inlined_call_operand.vmem [shape: f32[2,1], index: 9, kind: output, shape index: {}]  }
   0x1   :  { %v14_v0 = vstv %s1766_s8 }
   0x2   :  { %15 = vst [vmem:[#allocation3] sm:$0x1] %v14_v0 }
   0x3   :  { %16 = vsyncpa [#allocation5], 0  ;;  %s30_s13 = sshll.u32 %s1762_s4, 4  ;;  %s31_s13 = int_to_ptr.hbm [resolvable:$true] %s30_s13 }
   0x4   :  { %17 = vsyncpa [#allocation7], 0  ;;  %s1502_s14 = smov [#allocation4]   ;;  %s43_s18 = sshll.u32 %s1763_s5, 4  ;;  %s44_s18 = int_to_ptr.hbm [resolvable:$true] %s43_s18 }
   0x5   :  { %s32_s15 = sshll.u32 %s1502_s14, 4  ;;  %s1503_s19 = smov 64   ;;  %s33_s15 = int_to_ptr.vmem [resolvable:$true] %s32_s15 }
   0x6   :  { %s1504_s20 = smov 4   ;;  %s1505_s8 = smov [#allocation6]  }
   0x7   :  { %38 = dma.hbm_to_vmem [thread:$0]  %s31_s13, 256, %s33_s15, [#allocation5], %s1503_s19, %s1503_s19, %s1504_s20  }
   0x8   :  { %s45_s21 = sshll.u32 %s1505_s8, 4  ;;  %s46_s21 = int_to_ptr.vmem [resolvable:$true] %s45_s21 }
   0x9   :  { %51 = dma.hbm_to_vmem [thread:$0]  %s44_s18, 256, %s46_s21, [#allocation7], %s1503_s19, %s1503_s19, %s1504_s20  }
   0xa   :  { %1498 = dma.done.wait [#allocation5], 256  }
   0xb   :  { %1499 = vsyncadd [#allocation5], 4294967040 }
   0xc   :  { %1500 = dma.done.wait [#allocation7], 256  }
   0xd   :  { %1501 = vsyncadd [#allocation7], 4294967040  ;;  %vm83_vm0 = vcmask 1041408   ;;  %v67_v1 = vld [vmem:[%s1759_s1] sm:$0x3]  ;;  %v1304_v2 = vld [vmem:[%s1760_s2 + $0x8] sm:$0xff] }
   0xe   :  { %v73_v3 = vld [vmem:[%s1758_s0] sm:$0xff]  ;;  %v85_v4 = vsel %vm83_vm0, %v67_v1, 0  ;;  %v74_v5 = vld [vmem:[%s1758_s0 + $0x8] sm:$0xff]  ;;  %123 = vmatpush.bf16.msra.mxu1 %v1304_v2  ;;  %vm79_vm1 = vcmask 31744   ;;  %187 = vmatpush.bf16.msra.mxu2 %v1304_v2  ;;  %v1506_v8 = vmov 0   ;;  %vm113_vm6 = vcmask 261120  }
   0xf   :  { %94 = vmatpush.bf16.msra.mxu0 %v85_v4  ;;  %v75_v6 = vpack.c.bf16 %v74_v5, %v73_v3  ;;  %v1303_v7 = vld [vmem:[%s1760_s2] sm:$0xff]  ;;  %258 = vmatpush.bf16.msra.mxu3 %v1304_v2  ;;  %s1507_s2 = smov 32   ;;  %s1508_s11 = smov 96  }
  0x10   :  { %v1591_v9 = vld [vmem:[%s1761_s3] ss:$0 sm:$0xff] }
  0x12   :  { %1247 = vmatmul.msk.bf16.vlgmr.msra.gmra.mxu0 %vm79_vm1, %v75_v6  ;;  %124 = vmatpush.bf16.msra.mxu1 %v1303_v7 }
  0x13   :  { %329 = vmatpush.bf16.msrb.mxu0 %v1304_v2  ;;  %188 = vmatpush.bf16.msra.mxu2 %v1303_v7 }
  0x14   :  { %259 = vmatpush.bf16.msra.mxu3 %v1303_v7 }
  0x15   :  { %125 = vmatmul.bf16.vlgmr.msra.gmra.mxu1 %v1506_v8 }
  0x16   :  { %400 = vmatpush.bf16.msrb.mxu1 %v1304_v2 }
  0x17   :  { %330 = vmatpush.bf16.msrb.mxu0 %v1303_v7  ;;  %466 = vmatpush.bf16.msrb.mxu2 %v1304_v2 }
  0x18   :  { %536 = vmatpush.bf16.msrb.mxu3 %v1304_v2 }
  0x1a   :  { %401 = vmatpush.bf16.msrb.mxu1 %v1303_v7 }
  0x1b   :  { %606 = vmatpush.bf16.msra.mxu0 %v1304_v2  ;;  %467 = vmatpush.bf16.msrb.mxu2 %v1303_v7 }
  0x1c   :  { %537 = vmatpush.bf16.msrb.mxu3 %v1303_v7 }
  0x1f   :  { %607 = vmatpush.bf16.msra.mxu0 %v1303_v7 }
  0x8f   :  { %v96_v10 = vpop.f32.mrf.mxu0 }
  0x90   :  { %v1594_v11 = vadd.f32 %v1591_v9, %v96_v10 }
  0x92   :  { %v126_v12 = vpop.f32.mrf.mxu1 }
  0x93   :  { %v130_v13 = vadd.f32 %v126_v12, %v1594_v11 }
  0x95   :  { %1320 = vtanh.f32 %v130_v13  ;;  %v1256_v16 = vmul.f32 -1.442695, %v130_v13 }
  0x97   :  { %1322 = vpow2.f32 %v1256_v16 }
  0x9a   :  { %v128_v14 = vpop.f32.mrf.mxu1 }
  0x9b   :  { %v1321_v15 = vpop.eup %1320 }
  0x9c   :  { %153 = vrot.lane.b32.xlu0 %v1321_v15, %s1503_s19 }
  0x9d   :  { %v1323_v17 = vpop.eup %1322 }
  0x9e   :  { %v134_v18 = vadd.f32 1.0, %v1323_v17 }
  0xa0   :  { %1324 = vrcp.f32 %v134_v18  ;;  %v146_v24 = vand.u32 2147483648, %v134_v18  ;;  %vm140_vm3 = vweird.f32 %v134_v18  ;;  %v144_v25 = vand.u32 2147483647, %v134_v18 }
  0xa2   :  { %v147_v27 = vor.u32 1.1754944e-38, %v146_v24  ;;  %vm145_vm5 = vcmp.eq.f32.partialorder %v144_v25, 8.507059e+37 }
  0xa6   :  { %v1325_v19 = vpop.eup %1324 }
  0xa7   :  { %v136_v20 = vmul.f32 %v1325_v19, %v134_v18  ;;  %vm141_vm2 = vweird.f32 %v1325_v19 }
  0xa8   :  { %vm142_vm4 = vmor %vm140_vm3, %vm141_vm2 }
  0xa9   :  { %v137_v21 = vsub.f32 1.0, %v136_v20 }
  0xab   :  { %v138_v22 = vmul.f32 %v1325_v19, %v137_v21 }
  0xad   :  { %v139_v23 = vadd.f32 %v1325_v19, %v138_v22 }
  0xaf   :  { %v143_v26 = vsel %vm142_vm4, %v1325_v19, %v139_v23 }
  0xb0   :  { %v148_v29 = vsel %vm145_vm5, %v147_v27, %v143_v26 }
  0xb1   :  { %v151_v31 = vmul.f32 0.0, %v148_v29 }
 0x10e   :  { %v154_v28 = vpop.permute.xlu0 %153 }
 0x10f   :  { %v156_v30 = vmul.f32 %v154_v28, %v148_v29 }
 0x111   :  { %158 = vrot.lane.b32.xlu0 %v156_v30, %s1507_s2 }
 0x183   :  { %v159_v32 = vpop.permute.xlu0 %158 }
 0x184   :  { %v161_v33 = vadd.f32 %v159_v32, %v151_v31 }
 0x186   :  { %1326 = vtanh.f32 %v161_v33  ;;  %v219_v59 = vrot.slane %v161_v33, 6 }
 0x18c   :  { %v1327_v34 = vpop.eup %1326 }
 0x18d   :  { %164 = vrot.lane.b32.xlu1 %v1327_v34, %s1503_s19 }
 0x1ff   :  { %v165_v35 = vpop.permute.xlu1 %164 }
 0x200   :  { %v1600_v36 = vmul.f32 %v165_v35, %v148_v29 }
 0x202   :  { %v174_v37 = vpack.c.bf16 %v1600_v36, %v1600_v36 }
 0x204   :  { %176 = vrot.lane.b32.xlu1 %v174_v37, %s1507_s2 }
 0x276   :  { %v177_v38 = vpop.permute.xlu1 %176 }
 0x277   :  { %1257 = vmatmul.msk.bf16.vlgmr.msra.gmra.mxu2 %vm113_vm6, %v177_v38 }
 0x2fa   :  { %v190_v39 = vpop.f32.mrf.mxu2 }
 0x2fb   :  { %v195_v40 = vrot.slane %v190_v39, 6  ;;  %v98_v39 = vpop.f32.mrf.mxu0 }
 0x2fd   :  { %v197_v41 = vadd.f32 %v195_v40, %v1594_v11 }
 0x2ff   :  { %1328 = vtanh.f32 %v197_v41  ;;  %v1258_v44 = vmul.f32 -1.442695, %v197_v41 }
 0x301   :  { %1330 = vpow2.f32 %v1258_v44 }
 0x302   :  { %v192_v42 = vpop.f32.mrf.mxu2 }
 0x305   :  { %v1329_v43 = vpop.eup %1328 }
 0x306   :  { %223 = vrot.lane.b32.xlu2 %v1329_v43, %s1503_s19 }
 0x307   :  { %v1331_v45 = vpop.eup %1330 }
 0x308   :  { %v201_v46 = vadd.f32 1.0, %v1331_v45 }
 0x30a   :  { %1332 = vrcp.f32 %v201_v46  ;;  %v213_v52 = vand.u32 2147483648, %v201_v46  ;;  %vm207_vm8 = vweird.f32 %v201_v46  ;;  %v211_v53 = vand.u32 2147483647, %v201_v46 }
 0x30c   :  { %v214_v55 = vor.u32 1.1754944e-38, %v213_v52  ;;  %vm212_vm10 = vcmp.eq.f32.partialorder %v211_v53, 8.507059e+37 }
 0x310   :  { %v1333_v47 = vpop.eup %1332 }
 0x311   :  { %v203_v48 = vmul.f32 %v1333_v47, %v201_v46  ;;  %vm208_vm7 = vweird.f32 %v1333_v47 }
 0x312   :  { %vm209_vm9 = vmor %vm207_vm8, %vm208_vm7 }
 0x313   :  { %v204_v49 = vsub.f32 1.0, %v203_v48 }
 0x315   :  { %v205_v50 = vmul.f32 %v1333_v47, %v204_v49 }
 0x317   :  { %v206_v51 = vadd.f32 %v1333_v47, %v205_v50 }
 0x319   :  { %v210_v54 = vsel %vm209_vm9, %v1333_v47, %v206_v51 }
 0x31a   :  { %v215_v57 = vsel %vm212_vm10, %v214_v55, %v210_v54 }
 0x31b   :  { %v221_v60 = vmul.f32 %v219_v59, %v215_v57 }
 0x360   :  { %v224_v56 = vpop.permute.xlu2 %223 }
 0x361   :  { %v226_v58 = vmul.f32 %v224_v56, %v215_v57 }
 0x363   :  { %228 = vrot.lane.b32.xlu2 %v226_v58, %s1507_s2 }
 0x3bd   :  { %v229_v61 = vpop.permute.xlu2 %228 }
 0x3be   :  { %v231_v62 = vadd.f32 %v229_v61, %v221_v60 }
 0x3c0   :  { %1334 = vtanh.f32 %v231_v62  ;;  %v290_v28 = vrot.slane %v231_v62, 6 }
 0x3c6   :  { %v1335_v63 = vpop.eup %1334 }
 0x3c7   :  { %234 = vrot.lane.b32.xlu0 %v1335_v63, %s1503_s19 }
 0x439   :  { %v235_v0 = vpop.permute.xlu0 %234 }
 0x43a   :  { %v1610_v1 = vmul.f32 %v235_v0, %v215_v57 }
 0x43c   :  { %v244_v2 = vpack.c.bf16 %v1610_v1, %v1610_v1 }
 0x43e   :  { %v246_v3 = vrot.slane %v244_v2, 1 }
 0x440   :  { %247 = vrot.lane.b32.xlu1 %v246_v3, %s1507_s2 }
 0x4b2   :  { %v248_v4 = vpop.permute.xlu1 %247 }
 0x4b3   :  { %1259 = vmatmul.msk.bf16.vlgmr.msra.gmra.mxu3 %vm113_vm6, %v248_v4 }
 0x536   :  { %v261_v5 = vpop.f32.mrf.mxu3 }
 0x537   :  { %v266_v6 = vrot.slane %v261_v5, 4 }
 0x539   :  { %v268_v7 = vadd.f32 %v266_v6, %v1594_v11  ;;  %v1637_v6 = vadd.f32 %v1591_v9, %v98_v39 }
 0x53b   :  { %1336 = vtanh.f32 %v268_v7  ;;  %v1260_v13 = vmul.f32 -1.442695, %v268_v7 }
 0x53d   :  { %1338 = vpow2.f32 %v1260_v13 }
 0x53e   :  { %v263_v10 = vpop.f32.mrf.mxu3 }
 0x541   :  { %v1337_v12 = vpop.eup %1336 }
 0x542   :  { %294 = vrot.lane.b32.xlu2 %v1337_v12, %s1503_s19 }
 0x543   :  { %v1339_v14 = vpop.eup %1338 }
 0x544   :  { %v272_v15 = vadd.f32 1.0, %v1339_v14 }
 0x546   :  { %1340 = vrcp.f32 %v272_v15  ;;  %v284_v21 = vand.u32 2147483648, %v272_v15  ;;  %vm278_vm12 = vweird.f32 %v272_v15  ;;  %v282_v22 = vand.u32 2147483647, %v272_v15 }
 0x548   :  { %v285_v24 = vor.u32 1.1754944e-38, %v284_v21  ;;  %vm283_vm14 = vcmp.eq.f32.partialorder %v282_v22, 8.507059e+37 }
 0x54c   :  { %v1341_v16 = vpop.eup %1340 }
 0x54d   :  { %v274_v17 = vmul.f32 %v1341_v16, %v272_v15  ;;  %vm279_vm11 = vweird.f32 %v1341_v16 }
 0x54e   :  { %vm280_vm13 = vmor %vm278_vm12, %vm279_vm11 }
 0x54f   :  { %v275_v18 = vsub.f32 1.0, %v274_v17 }
 0x551   :  { %v276_v19 = vmul.f32 %v1341_v16, %v275_v18 }
 0x553   :  { %v277_v20 = vadd.f32 %v1341_v16, %v276_v19 }
 0x555   :  { %v281_v23 = vsel %vm280_vm13, %v1341_v16, %v277_v20 }
 0x556   :  { %v286_v26 = vsel %vm283_vm14, %v285_v24, %v281_v23 }
 0x557   :  { %v292_v29 = vmul.f32 %v290_v28, %v286_v26 }
 0x59c   :  { %v295_v25 = vpop.permute.xlu2 %294 }
 0x59d   :  { %v297_v27 = vmul.f32 %v295_v25, %v286_v26 }
 0x59f   :  { %299 = vrot.lane.b32.xlu0 %v297_v27, %s1507_s2 }
 0x611   :  { %v300_v30 = vpop.permute.xlu0 %299 }
 0x612   :  { %v302_v31 = vadd.f32 %v300_v30, %v292_v29 }
 0x614   :  { %1342 = vtanh.f32 %v302_v31  ;;  %v361_v59 = vrot.slane %v302_v31, 6 }
 0x61a   :  { %v1343_v32 = vpop.eup %1342 }
 0x61b   :  { %305 = vrot.lane.b32.xlu1 %v1343_v32, %s1503_s19 }
 0x68d   :  { %v306_v33 = vpop.permute.xlu1 %305 }
 0x68e   :  { %v1620_v34 = vmul.f32 %v306_v33, %v286_v26 }
 0x690   :  { %v315_v35 = vpack.c.bf16 %v1620_v34, %v1620_v34 }
 0x692   :  { %v317_v37 = vrot.slane %v315_v35, 2 }
 0x694   :  { %318 = vrot.lane.b32.xlu2 %v317_v37, %s1507_s2 }
 0x6ee   :  { %v319_v38 = vpop.permute.xlu2 %318 }
 0x6ef   :  { %1261 = vmatmul.msk.bf16.vlgmr.msrb.gmra.mxu0 %vm113_vm6, %v319_v38 }
 0x76c   :  { %v332_v40 = vpop.f32.mrf.mxu0 }
 0x76d   :  { %v337_v41 = vrot.slane %v332_v40, 2 }
 0x76f   :  { %v339_v42 = vadd.f32 %v337_v41, %v1594_v11 }
 0x771   :  { %1344 = vtanh.f32 %v339_v42  ;;  %v1262_v45 = vmul.f32 -1.442695, %v339_v42 }
 0x773   :  { %1346 = vpow2.f32 %v1262_v45 }
 0x774   :  { %v334_v43 = vpop.f32.mrf.mxu0 }
 0x777   :  { %v1345_v44 = vpop.eup %1344 }
 0x778   :  { %365 = vrot.lane.b32.xlu0 %v1345_v44, %s1503_s19 }
 0x779   :  { %v1347_v46 = vpop.eup %1346 }
 0x77a   :  { %v343_v47 = vadd.f32 1.0, %v1347_v46 }
 0x77c   :  { %1348 = vrcp.f32 %v343_v47  ;;  %v355_v53 = vand.u32 2147483648, %v343_v47  ;;  %vm349_vm0 = vweird.f32 %v343_v47  ;;  %v353_v54 = vand.u32 2147483647, %v343_v47 }
 0x77e   :  { %v356_v55 = vor.u32 1.1754944e-38, %v355_v53  ;;  %vm354_vm2 = vcmp.eq.f32.partialorder %v353_v54, 8.507059e+37 }
 0x782   :  { %v1349_v48 = vpop.eup %1348 }
 0x783   :  { %v345_v49 = vmul.f32 %v1349_v48, %v343_v47  ;;  %vm350_vm15 = vweird.f32 %v1349_v48 }
 0x784   :  { %vm351_vm1 = vmor %vm349_vm0, %vm350_vm15 }
 0x785   :  { %v346_v50 = vsub.f32 1.0, %v345_v49 }
 0x787   :  { %v347_v51 = vmul.f32 %v1349_v48, %v346_v50 }
 0x789   :  { %v348_v52 = vadd.f32 %v1349_v48, %v347_v51 }
 0x78b   :  { %v352_v11 = vsel %vm351_vm1, %v1349_v48, %v348_v52 }
 0x78c   :  { %v357_v57 = vsel %vm354_vm2, %v356_v55, %v352_v11 }
 0x78d   :  { %v363_v60 = vmul.f32 %v361_v59, %v357_v57 }
 0x7ea   :  { %v366_v56 = vpop.permute.xlu0 %365 }
 0x7eb   :  { %v368_v58 = vmul.f32 %v366_v56, %v357_v57 }
 0x7ed   :  { %370 = vrot.lane.b32.xlu1 %v368_v58, %s1507_s2 }
 0x85f   :  { %v371_v61 = vpop.permute.xlu1 %370 }
 0x860   :  { %v373_v62 = vadd.f32 %v371_v61, %v363_v60 }
 0x862   :  { %1350 = vtanh.f32 %v373_v62  ;;  %v429_v28 = vrot.slane %v373_v62, 6 }
 0x868   :  { %v1351_v63 = vpop.eup %1350 }
 0x869   :  { %376 = vrot.lane.b32.xlu2 %v1351_v63, %s1503_s19 }
 0x8c3   :  { %v377_v0 = vpop.permute.xlu2 %376 }
 0x8c4   :  { %v1630_v2 = vmul.f32 %v377_v0, %v357_v57 }
 0x8c6   :  { %v386_v3 = vpack.c.bf16 %v1630_v2, %v1630_v2 }
 0x8c8   :  { %v388_v4 = vrot.slane %v386_v3, 3 }
 0x8ca   :  { %389 = vrot.lane.b32.xlu0 %v388_v4, %s1507_s2 }
 0x93c   :  { %v390_v5 = vpop.permute.xlu0 %389 }
 0x93d   :  { %1263 = vmatmul.msk.bf16.vlgmr.msrb.gmra.mxu1 %vm113_vm6, %v390_v5 }
 0x9ba   :  { %v403_v7 = vpop.f32.mrf.mxu1 }
 0x9bb   :  { %v407_v10 = vadd.f32 %v403_v7, %v1637_v6 }
 0x9bd   :  { %1352 = vtanh.f32 %v407_v10  ;;  %v1264_v14 = vmul.f32 -1.442695, %v407_v10 }
 0x9bf   :  { %1354 = vpow2.f32 %v1264_v14 }
 0x9c2   :  { %v405_v12 = vpop.f32.mrf.mxu1 }
 0x9c3   :  { %v1353_v13 = vpop.eup %1352 }
 0x9c4   :  { %433 = vrot.lane.b32.xlu1 %v1353_v13, %s1503_s19 }
 0x9c5   :  { %v1355_v15 = vpop.eup %1354 }
 0x9c6   :  { %v411_v16 = vadd.f32 1.0, %v1355_v15 }
 0x9c8   :  { %1356 = vrcp.f32 %v411_v16  ;;  %v423_v9 = vand.u32 2147483648, %v411_v16  ;;  %vm417_vm4 = vweird.f32 %v411_v16  ;;  %v421_v22 = vand.u32 2147483647, %v411_v16 }
 0x9ca   :  { %v424_v24 = vor.u32 1.1754944e-38, %v423_v9  ;;  %vm422_vm7 = vcmp.eq.f32.partialorder %v421_v22, 8.507059e+37 }
 0x9ce   :  { %v1357_v17 = vpop.eup %1356 }
 0x9cf   :  { %v413_v18 = vmul.f32 %v1357_v17, %v411_v16  ;;  %vm418_vm3 = vweird.f32 %v1357_v17 }
 0x9d0   :  { %vm419_vm5 = vmor %vm417_vm4, %vm418_vm3  ;;  %vm172_vm4 = vcmask 254976  }
 0x9d1   :  { %v414_v19 = vsub.f32 1.0, %v413_v18 }
 0x9d3   :  { %v415_v20 = vmul.f32 %v1357_v17, %v414_v19 }
 0x9d5   :  { %v416_v21 = vadd.f32 %v1357_v17, %v415_v20 }
 0x9d7   :  { %v420_v23 = vsel %vm419_vm5, %v1357_v17, %v416_v21  ;;  %vm384_vm5 = vcmask 261126  }
 0x9d8   :  { %v425_v26 = vsel %vm422_vm7, %v424_v24, %v420_v23  ;;  %vm313_vm7 = vcmask 259076  }
 0x9d9   :  { %v431_v29 = vmul.f32 %v429_v28, %v425_v26 }
 0xa36   :  { %v434_v25 = vpop.permute.xlu1 %433 }
 0xa37   :  { %v436_v27 = vmul.f32 %v434_v25, %v425_v26 }
 0xa39   :  { %438 = vrot.lane.b32.xlu2 %v436_v27, %s1507_s2 }
 0xa93   :  { %v439_v30 = vpop.permute.xlu2 %438 }
 0xa94   :  { %v441_v31 = vadd.f32 %v439_v30, %v431_v29 }
 0xa96   :  { %1358 = vtanh.f32 %v441_v31  ;;  %v498_v58 = vrot.slane %v441_v31, 6 }
 0xa9c   :  { %v1359_v32 = vpop.eup %1358 }
 0xa9d   :  { %444 = vrot.lane.b32.xlu0 %v1359_v32, %s1503_s19 }
 0xb0f   :  { %v445_v33 = vpop.permute.xlu0 %444 }
 0xb10   :  { %v1643_v35 = vmul.f32 %v445_v33, %v425_v26 }
 0xb12   :  { %v453_v37 = vpack.c.bf16 %v1643_v35, %v1643_v35 }
 0xb14   :  { %455 = vrot.lane.b32.xlu1 %v453_v37, %s1507_s2 }
 0xb86   :  { %v456_v38 = vpop.permute.xlu1 %455 }
 0xb87   :  { %1265 = vmatmul.msk.bf16.vlgmr.msrb.gmra.mxu2 %vm113_vm6, %v456_v38 }
 0xc0a   :  { %v469_v39 = vpop.f32.mrf.mxu2 }
 0xc0b   :  { %v474_v40 = vrot.slane %v469_v39, 6 }
 0xc0d   :  { %v476_v41 = vadd.f32 %v474_v40, %v1637_v6 }
 0xc0f   :  { %1360 = vtanh.f32 %v476_v41  ;;  %v1266_v44 = vmul.f32 -1.442695, %v476_v41 }
 0xc11   :  { %1362 = vpow2.f32 %v1266_v44 }
 0xc12   :  { %v471_v42 = vpop.f32.mrf.mxu2 }
 0xc15   :  { %v1361_v43 = vpop.eup %1360 }
 0xc16   :  { %502 = vrot.lane.b32.xlu2 %v1361_v43, %s1503_s19 }
 0xc17   :  { %v1363_v45 = vpop.eup %1362 }
 0xc18   :  { %v480_v46 = vadd.f32 1.0, %v1363_v45 }
 0xc1a   :  { %1364 = vrcp.f32 %v480_v46  ;;  %v492_v52 = vand.u32 2147483648, %v480_v46  ;;  %vm486_vm9 = vweird.f32 %v480_v46  ;;  %v490_v53 = vand.u32 2147483647, %v480_v46 }
 0xc1c   :  { %v493_v11 = vor.u32 1.1754944e-38, %v492_v52  ;;  %vm491_vm11 = vcmp.eq.f32.partialorder %v490_v53, 8.507059e+37 }
 0xc20   :  { %v1365_v47 = vpop.eup %1364 }
 0xc21   :  { %v482_v48 = vmul.f32 %v1365_v47, %v480_v46  ;;  %vm487_vm8 = vweird.f32 %v1365_v47 }
 0xc22   :  { %vm488_vm10 = vmor %vm486_vm9, %vm487_vm8  ;;  %vm242_vm8 = vcmask 257026  }
 0xc23   :  { %v483_v49 = vsub.f32 1.0, %v482_v48 }
 0xc25   :  { %v484_v50 = vmul.f32 %v1365_v47, %v483_v49 }
 0xc27   :  { %v485_v51 = vadd.f32 %v1365_v47, %v484_v50 }
 0xc29   :  { %v489_v54 = vsel %vm488_vm10, %v1365_v47, %v485_v51 }
 0xc2a   :  { %v494_v56 = vsel %vm491_vm11, %v493_v11, %v489_v54 }
 0xc2b   :  { %v500_v59 = vmul.f32 %v498_v58, %v494_v56 }
 0xc70   :  { %v503_v55 = vpop.permute.xlu2 %502 }
 0xc71   :  { %v505_v57 = vmul.f32 %v503_v55, %v494_v56 }
 0xc73   :  { %507 = vrot.lane.b32.xlu0 %v505_v57, %s1507_s2 }
 0xce5   :  { %v508_v60 = vpop.permute.xlu0 %507 }
 0xce6   :  { %v510_v61 = vadd.f32 %v508_v60, %v500_v59 }
 0xce8   :  { %1366 = vtanh.f32 %v510_v61  ;;  %v568_v29 = vrot.slane %v510_v61, 6 }
 0xcee   :  { %v1367_v62 = vpop.eup %1366 }
 0xcef   :  { %513 = vrot.lane.b32.xlu1 %v1367_v62, %s1503_s19 }
 0xd61   :  { %v514_v63 = vpop.permute.xlu1 %513 }
 0xd62   :  { %v1653_v0 = vmul.f32 %v514_v63, %v494_v56 }
 0xd64   :  { %v522_v3 = vpack.c.bf16 %v1653_v0, %v1653_v0 }
 0xd66   :  { %v524_v4 = vrot.slane %v522_v3, 1 }
 0xd68   :  { %525 = vrot.lane.b32.xlu2 %v524_v4, %s1507_s2 }
 0xdc2   :  { %v526_v5 = vpop.permute.xlu2 %525 }
 0xdc3   :  { %1267 = vmatmul.msk.bf16.vlgmr.msrb.gmra.mxu3 %vm113_vm6, %v526_v5 }
 0xe46   :  { %v539_v7 = vpop.f32.mrf.mxu3 }
 0xe47   :  { %v544_v10 = vrot.slane %v539_v7, 4  ;;  %v1306_v7 = vld [vmem:[#allocation4 + $0x8] sm:$0xff] }
 0xe48   :  { %698 = vmatpush.bf16.msra.mxu1 %v1306_v7 }
 0xe49   :  { %v546_v12 = vadd.f32 %v544_v10, %v1637_v6  ;;  %v1307_v10 = vld [vmem:[#allocation6] sm:$0xff] }
 0xe4b   :  { %1368 = vtanh.f32 %v546_v12  ;;  %v1268_v15 = vmul.f32 -1.442695, %v546_v12 }
 0xe4d   :  { %1370 = vpow2.f32 %v1268_v15 }
 0xe4e   :  { %v541_v13 = vpop.f32.mrf.mxu3 }
 0xe51   :  { %v1369_v14 = vpop.eup %1368 }
 0xe52   :  { %572 = vrot.lane.b32.xlu0 %v1369_v14, %s1503_s19  ;;  %v1305_v14 = vld [vmem:[#allocation4] sm:$0xff] }
 0xe53   :  { %v1371_v16 = vpop.eup %1370  ;;  %699 = vmatpush.bf16.msra.mxu1 %v1305_v14 }
 0xe54   :  { %v550_v17 = vadd.f32 1.0, %v1371_v16 }
 0xe56   :  { %1372 = vrcp.f32 %v550_v17  ;;  %v562_v22 = vand.u32 2147483648, %v550_v17  ;;  %vm556_vm13 = vweird.f32 %v550_v17  ;;  %v560_v23 = vand.u32 2147483647, %v550_v17 }
 0xe58   :  { %v563_v25 = vor.u32 1.1754944e-38, %v562_v22  ;;  %vm561_vm15 = vcmp.eq.f32.partialorder %v560_v23, 8.507059e+37 }
 0xe5c   :  { %v1373_v18 = vpop.eup %1372 }
 0xe5d   :  { %v552_v19 = vmul.f32 %v1373_v18, %v550_v17  ;;  %vm557_vm12 = vweird.f32 %v1373_v18 }
 0xe5e   :  { %vm558_vm14 = vmor %vm556_vm13, %vm557_vm12 }
 0xe5f   :  { %v553_v20 = vsub.f32 1.0, %v552_v19 }
 0xe61   :  { %v554_v21 = vmul.f32 %v1373_v18, %v553_v20  ;;  %v1696_v20 = vld [vmem:[%s1764_s6] ss:$0 sm:$0xff] }
 0xe63   :  { %v555_v9 = vadd.f32 %v1373_v18, %v554_v21 }
 0xe65   :  { %v559_v24 = vsel %vm558_vm14, %v1373_v18, %v555_v9 }
 0xe66   :  { %v564_v27 = vsel %vm561_vm15, %v563_v25, %v559_v24 }
 0xe67   :  { %v570_v30 = vmul.f32 %v568_v29, %v564_v27 }
 0xec4   :  { %v573_v26 = vpop.permute.xlu0 %572 }
 0xec5   :  { %v575_v28 = vmul.f32 %v573_v26, %v564_v27 }
 0xec7   :  { %577 = vrot.lane.b32.xlu1 %v575_v28, %s1507_s2 }
 0xf39   :  { %v578_v31 = vpop.permute.xlu1 %577 }
 0xf3a   :  { %v580_v32 = vadd.f32 %v578_v31, %v570_v30 }
 0xf3c   :  { %1374 = vtanh.f32 %v580_v32  ;;  %v638_v61 = vrot.slane %v580_v32, 6 }
 0xf42   :  { %v1375_v33 = vpop.eup %1374 }
 0xf43   :  { %583 = vrot.lane.b32.xlu2 %v1375_v33, %s1503_s19 }
 0xf9d   :  { %v584_v37 = vpop.permute.xlu2 %583 }
 0xf9e   :  { %v586_v38 = vmul.f32 %v584_v37, %v564_v27 }
 0xfa0   :  { %v592_v39 = vpack.c.bf16 %v586_v38, %v586_v38 }
 0xfa2   :  { %v594_v40 = vrot.slane %v592_v39, 2 }
 0xfa4   :  { %595 = vrot.lane.b32.xlu0 %v594_v40, %s1507_s2 }
0x1016   :  { %v596_v41 = vpop.permute.xlu0 %595 }
0x1017   :  { %1269 = vmatmul.msk.bf16.vlgmr.msra.gmra.mxu0 %vm113_vm6, %v596_v41 }
0x1094   :  { %v609_v42 = vpop.f32.mrf.mxu0 }
0x1095   :  { %v614_v43 = vrot.slane %v609_v42, 2 }
0x1097   :  { %v616_v44 = vadd.f32 %v614_v43, %v1637_v6 }
0x1099   :  { %1376 = vtanh.f32 %v616_v44  ;;  %v1270_v47 = vmul.f32 -1.442695, %v616_v44 }
0x109b   :  { %1378 = vpow2.f32 %v1270_v47 }
0x109c   :  { %v611_v45 = vpop.f32.mrf.mxu0 }
0x109f   :  { %v1377_v46 = vpop.eup %1376 }
0x10a0   :  { %642 = vrot.lane.b32.xlu1 %v1377_v46, %s1503_s19 }
0x10a1   :  { %v1379_v48 = vpop.eup %1378 }
0x10a2   :  { %v620_v49 = vadd.f32 1.0, %v1379_v48 }
0x10a4   :  { %1380 = vrcp.f32 %v620_v49  ;;  %v632_v54 = vand.u32 2147483648, %v620_v49  ;;  %vm626_vm1 = vweird.f32 %v620_v49  ;;  %v630_v11 = vand.u32 2147483647, %v620_v49 }
0x10a6   :  { %v633_v55 = vor.u32 1.1754944e-38, %v632_v54  ;;  %vm631_vm3 = vcmp.eq.f32.partialorder %v630_v11, 8.507059e+37 }
0x10a8   :  { %169 = vrot.lane.b32.xlu1 %v1600_v36, %s1507_s2 }
0x10aa   :  { %v1381_v50 = vpop.eup %1380 }
0x10ab   :  { %v622_v6 = vmul.f32 %v1381_v50, %v620_v49  ;;  %vm627_vm0 = vweird.f32 %v1381_v50 }
0x10ac   :  { %vm628_vm2 = vmor %vm626_vm1, %vm627_vm0 }
0x10ad   :  { %v623_v51 = vsub.f32 1.0, %v622_v6 }
0x10af   :  { %v624_v52 = vmul.f32 %v1381_v50, %v623_v51 }
0x10b0   :  { %381 = vrot.lane.b32.xlu1 %v1630_v2, %s1507_s2 }
0x10b1   :  { %v625_v53 = vadd.f32 %v1381_v50, %v624_v52 }
0x10b3   :  { %v629_v36 = vsel %vm628_vm2, %v1381_v50, %v625_v53 }
0x10b4   :  { %v634_v56 = vsel %vm631_vm3, %v633_v55, %v629_v36 }
0x10b5   :  { %v640_v62 = vmul.f32 %v638_v61, %v634_v56 }
0x10b8   :  { %588 = vrot.lane.b32.xlu1 %v586_v38, %s1507_s2 }
0x1112   :  { %v643_v2 = vpop.permute.xlu1 %642 }
0x1113   :  { %v645_v57 = vmul.f32 %v643_v2, %v634_v56 }
0x1115   :  { %647 = vrot.lane.b32.xlu2 %v645_v57, %s1507_s2 }
0x111a   :  { %v170_v58 = vpop.permute.xlu1 %169 }
0x111b   :  { %173 = vst.msk [vmem:[#allocation2] sm:$0x3] %vm172_vm4, %v170_v58 }
0x111d   :  { %239 = vrot.lane.b32.xlu2 %v1610_v1, %s1507_s2 }
0x1122   :  { %v382_v59 = vpop.permute.xlu1 %381 }
0x1123   :  { %385 = vst.msk [vmem:[#allocation2] sm:$0xc0] %vm384_vm5, %v382_v59 }
0x1125   :  { %449 = vrot.lane.b32.xlu2 %v1643_v35, %s1507_s2  ;;  %v1308_v35 = vld [vmem:[#allocation6 + $0x8] sm:$0xff] }
0x1126   :  { %724 = vmatpush.bf16.msra.mxu2 %v1308_v35  ;;  %782 = vmatpush.bf16.msra.mxu3 %v1308_v35 }
0x1127   :  { %847 = vmatpush.bf16.msrb.mxu0 %v1308_v35  ;;  %912 = vmatpush.bf16.msrb.mxu1 %v1308_v35 }
0x112a   :  { %v589_v60 = vpop.permute.xlu1 %588  ;;  %725 = vmatpush.bf16.msra.mxu2 %v1307_v10  ;;  %783 = vmatpush.bf16.msra.mxu3 %v1307_v10 }
0x112b   :  { %591 = vst.msk [vmem:[#allocation2 + $0x8] sm:$0x30] %vm313_vm7, %v589_v60  ;;  %848 = vmatpush.bf16.msrb.mxu0 %v1307_v10  ;;  %913 = vmatpush.bf16.msrb.mxu1 %v1307_v10 }
0x112d   :  { %726 = vmatmul.bf16.vlgmr.msra.gmra.mxu2 %v1506_v8 }
0x112e   :  { %977 = vmatpush.bf16.msrb.mxu2 %v1308_v35  ;;  %1038 = vmatpush.bf16.msrb.mxu3 %v1308_v35 }
0x112f   :  { %1103 = vmatpush.bf16.msra.mxu0 %v1308_v35 }
0x1132   :  { %978 = vmatpush.bf16.msrb.mxu2 %v1307_v10  ;;  %1039 = vmatpush.bf16.msrb.mxu3 %v1307_v10 }
0x1133   :  { %1104 = vmatpush.bf16.msra.mxu0 %v1307_v10 }
0x116f   :  { %v648_v63 = vpop.permute.xlu2 %647 }
0x1170   :  { %v650_v3 = vadd.f32 %v648_v63, %v640_v62 }
0x1172   :  { %1382 = vtanh.f32 %v650_v3 }
0x1177   :  { %v240_v4 = vpop.permute.xlu2 %239 }
0x1178   :  { %v1383_v5 = vpop.eup %1382  ;;  %243 = vst.msk [vmem:[#allocation2] sm:$0xc] %vm242_vm8, %v240_v4 }
0x1179   :  { %653 = vrot.lane.b32.xlu0 %v1383_v5, %s1503_s19 }
0x117f   :  { %v450_v1 = vpop.permute.xlu2 %449 }
0x1180   :  { %452 = vst.msk [vmem:[#allocation2 + $0x8] sm:$0x3] %vm172_vm4, %v450_v1 }
0x1181   :  { %310 = vrot.lane.b32.xlu0 %v1620_v34, %s1507_s2 }
0x1189   :  { %518 = vrot.lane.b32.xlu0 %v1653_v0, %s1507_s2 }
0x11b0   :  { %v727_v18 = vpop.f32.mrf.mxu2 }
0x11b8   :  { %v729_v19 = vpop.f32.mrf.mxu2 }
0x11eb   :  { %v654_v34 = vpop.permute.xlu0 %653 }
0x11ec   :  { %v656_v0 = vmul.f32 %v654_v34, %v634_v56 }
0x11ee   :  { %658 = vrot.lane.b32.xlu2 %v656_v0, %s1507_s2 }
0x11f3   :  { %v311_v12 = vpop.permute.xlu0 %310 }
0x11f4   :  { %314 = vst.msk [vmem:[#allocation2] sm:$0x30] %vm313_vm7, %v311_v12 }
0x11fb   :  { %v519_v13 = vpop.permute.xlu0 %518  ;;  %v671_v8 = vld [vmem:[#allocation2] sm:$0xff] }
0x11fc   :  { %521 = vst.msk [vmem:[#allocation2 + $0x8] sm:$0xc] %vm242_vm8, %v519_v13 }
0x1248   :  { %v659_v15 = vpop.permute.xlu2 %658 }
0x1249   :  { %661 = vst.msk [vmem:[#allocation2 + $0x8] sm:$0xc0] %vm384_vm5, %v659_v15 }
0x1250   :  { %v672_v16 = vld [vmem:[#allocation2 + $0x8] sm:$0xff] }
0x1251   :  { %v673_v17 = vpack.c.bf16 %v672_v16, %v671_v8 }
0x1253   :  { %1279 = vmatmul.msk.bf16.vlgmr.msra.gmra.mxu1 %vm113_vm6, %v673_v17 }
0x1254   :  { %1168 = vmatpush.bf16.msra.mxu1 %v1308_v35 }
0x1258   :  { %1169 = vmatpush.bf16.msra.mxu1 %v1307_v10 }
0x12d0   :  { %v701_v21 = vpop.f32.mrf.mxu1 }
0x12d1   :  { %v1699_v9 = vadd.f32 %v1696_v20, %v701_v21 }
0x12d3   :  { %v731_v22 = vadd.f32 %v727_v18, %v1699_v9 }
0x12d5   :  { %1384 = vtanh.f32 %v731_v22  ;;  %v1288_v24 = vmul.f32 -1.442695, %v731_v22 }
0x12d7   :  { %1386 = vpow2.f32 %v1288_v24 }
0x12db   :  { %v1385_v23 = vpop.eup %1384 }
0x12dc   :  { %754 = vrot.lane.b32.xlu0 %v1385_v23, %s1503_s19 }
0x12dd   :  { %v1387_v25 = vpop.eup %1386 }
0x12de   :  { %v735_v26 = vadd.f32 1.0, %v1387_v25 }
0x12e0   :  { %1388 = vrcp.f32 %v735_v26  ;;  %v747_v32 = vand.u32 2147483648, %v735_v26  ;;  %vm741_vm10 = vweird.f32 %v735_v26  ;;  %v745_v33 = vand.u32 2147483647, %v735_v26 }
0x12e2   :  { %v748_v38 = vor.u32 1.1754944e-38, %v747_v32  ;;  %vm746_vm12 = vcmp.eq.f32.partialorder %v745_v33, 8.507059e+37 }
0x12e6   :  { %v1389_v27 = vpop.eup %1388 }
0x12e7   :  { %v737_v28 = vmul.f32 %v1389_v27, %v735_v26  ;;  %vm742_vm9 = vweird.f32 %v1389_v27 }
0x12e8   :  { %vm743_vm11 = vmor %vm741_vm10, %vm742_vm9 }
0x12e9   :  { %v738_v29 = vsub.f32 1.0, %v737_v28 }
0x12eb   :  { %v739_v30 = vmul.f32 %v1389_v27, %v738_v29 }
0x12ed   :  { %v740_v31 = vadd.f32 %v1389_v27, %v739_v30 }
0x12ef   :  { %v744_v37 = vsel %vm743_vm11, %v1389_v27, %v740_v31 }
0x12f0   :  { %v749_v40 = vsel %vm746_vm12, %v748_v38, %v744_v37 }
0x12f1   :  { %v752_v42 = vmul.f32 0.0, %v749_v40 }
0x134e   :  { %v755_v39 = vpop.permute.xlu0 %754 }
0x134f   :  { %v757_v41 = vmul.f32 %v755_v39, %v749_v40 }
0x1351   :  { %759 = vrot.lane.b32.xlu1 %v757_v41, %s1507_s2 }
0x13c3   :  { %v760_v43 = vpop.permute.xlu1 %759 }
0x13c4   :  { %v762_v44 = vadd.f32 %v760_v43, %v752_v42 }
0x13c6   :  { %1390 = vtanh.f32 %v762_v44  ;;  %v814_v5 = vrot.slane %v762_v44, 6 }
0x13cc   :  { %v1391_v45 = vpop.eup %1390 }
0x13cd   :  { %765 = vrot.lane.b32.xlu2 %v1391_v45, %s1503_s19 }
0x1427   :  { %v766_v46 = vpop.permute.xlu2 %765 }
0x1428   :  { %v768_v47 = vmul.f32 %v766_v46, %v749_v40 }
0x142a   :  { %v769_v48 = vpack.c.bf16 %v768_v47, %v768_v47 }
0x142c   :  { %771 = vrot.lane.b32.xlu0 %v769_v48, %s1507_s2  ;;  %v703_v48 = vpop.f32.mrf.mxu1 }
0x149e   :  { %v772_v49 = vpop.permute.xlu0 %771 }
0x149f   :  { %1289 = vmatmul.msk.bf16.vlgmr.msra.gmra.mxu3 %vm113_vm6, %v772_v49 }
0x1522   :  { %v785_v50 = vpop.f32.mrf.mxu3 }
0x1523   :  { %v790_v6 = vrot.slane %v785_v50, 6 }
0x1525   :  { %v792_v51 = vadd.f32 %v790_v6, %v1699_v9 }
0x1527   :  { %1392 = vtanh.f32 %v792_v51  ;;  %v1290_v54 = vmul.f32 -1.442695, %v792_v51 }
0x1529   :  { %1394 = vpow2.f32 %v1290_v54 }
0x152a   :  { %v787_v52 = vpop.f32.mrf.mxu3 }
0x152d   :  { %v1393_v53 = vpop.eup %1392 }
0x152e   :  { %818 = vrot.lane.b32.xlu1 %v1393_v53, %s1503_s19 }
0x152f   :  { %v1395_v11 = vpop.eup %1394 }
0x1530   :  { %v796_v36 = vadd.f32 1.0, %v1395_v11 }
0x1532   :  { %1396 = vrcp.f32 %v796_v36  ;;  %v808_v59 = vand.u32 2147483648, %v796_v36  ;;  %vm802_vm14 = vweird.f32 %v796_v36  ;;  %v806_v60 = vand.u32 2147483647, %v796_v36 }
0x1534   :  { %v809_v62 = vor.u32 1.1754944e-38, %v808_v59  ;;  %vm807_vm0 = vcmp.eq.f32.partialorder %v806_v60, 8.507059e+37 }
0x1538   :  { %v1397_v55 = vpop.eup %1396 }
0x1539   :  { %v798_v2 = vmul.f32 %v1397_v55, %v796_v36  ;;  %vm803_vm13 = vweird.f32 %v1397_v55 }
0x153a   :  { %vm804_vm15 = vmor %vm802_vm14, %vm803_vm13 }
0x153b   :  { %v799_v56 = vsub.f32 1.0, %v798_v2 }
0x153d   :  { %v800_v57 = vmul.f32 %v1397_v55, %v799_v56 }
0x153f   :  { %v801_v58 = vadd.f32 %v1397_v55, %v800_v57 }
0x1541   :  { %v805_v61 = vsel %vm804_vm15, %v1397_v55, %v801_v58 }
0x1542   :  { %v810_v3 = vsel %vm807_vm0, %v809_v62, %v805_v61 }
0x1543   :  { %v816_v1 = vmul.f32 %v814_v5, %v810_v3 }
0x15a0   :  { %v819_v63 = vpop.permute.xlu1 %818 }
0x15a1   :  { %v821_v4 = vmul.f32 %v819_v63, %v810_v3 }
0x15a3   :  { %823 = vrot.lane.b32.xlu2 %v821_v4, %s1507_s2 }
0x15fd   :  { %v824_v35 = vpop.permute.xlu2 %823 }
0x15fe   :  { %v826_v7 = vadd.f32 %v824_v35, %v816_v1 }
0x1600   :  { %1398 = vtanh.f32 %v826_v7  ;;  %v879_v38 = vrot.slane %v826_v7, 6 }
0x1606   :  { %v1399_v10 = vpop.eup %1398 }
0x1607   :  { %829 = vrot.lane.b32.xlu0 %v1399_v10, %s1503_s19 }
0x1679   :  { %v830_v34 = vpop.permute.xlu0 %829 }
0x167a   :  { %v832_v0 = vmul.f32 %v830_v34, %v810_v3 }
0x167c   :  { %v833_v12 = vpack.c.bf16 %v832_v0, %v832_v0 }
0x167e   :  { %v835_v13 = vrot.slane %v833_v12, 1 }
0x1680   :  { %836 = vrot.lane.b32.xlu1 %v835_v13, %s1507_s2  ;;  %v1726_v13 = vadd.f32 %v1696_v20, %v703_v48 }
0x16f2   :  { %v837_v14 = vpop.permute.xlu1 %836 }
0x16f3   :  { %1291 = vmatmul.msk.bf16.vlgmr.msrb.gmra.mxu0 %vm113_vm6, %v837_v14 }
0x1770   :  { %v850_v15 = vpop.f32.mrf.mxu0 }
0x1771   :  { %v855_v8 = vrot.slane %v850_v15, 4 }
0x1773   :  { %v857_v16 = vadd.f32 %v855_v8, %v1699_v9 }
0x1775   :  { %1400 = vtanh.f32 %v857_v16  ;;  %v1292_v19 = vmul.f32 -1.442695, %v857_v16 }
0x1777   :  { %1402 = vpow2.f32 %v1292_v19 }
0x1778   :  { %v852_v17 = vpop.f32.mrf.mxu0 }
0x177b   :  { %v1401_v18 = vpop.eup %1400 }
0x177c   :  { %883 = vrot.lane.b32.xlu2 %v1401_v18, %s1503_s19 }
0x177d   :  { %v1403_v21 = vpop.eup %1402 }
0x177e   :  { %v861_v22 = vadd.f32 1.0, %v1403_v21 }
0x1780   :  { %1404 = vrcp.f32 %v861_v22  ;;  %v873_v28 = vand.u32 2147483648, %v861_v22  ;;  %vm867_vm2 = vweird.f32 %v861_v22  ;;  %v871_v29 = vand.u32 2147483647, %v861_v22 }
0x1782   :  { %v874_v31 = vor.u32 1.1754944e-38, %v873_v28  ;;  %vm872_vm4 = vcmp.eq.f32.partialorder %v871_v29, 8.507059e+37 }
0x1786   :  { %v1405_v23 = vpop.eup %1404 }
0x1787   :  { %v863_v24 = vmul.f32 %v1405_v23, %v861_v22  ;;  %vm868_vm1 = vweird.f32 %v1405_v23 }
0x1788   :  { %vm869_vm3 = vmor %vm867_vm2, %vm868_vm1 }
0x1789   :  { %v864_v25 = vsub.f32 1.0, %v863_v24 }
0x178b   :  { %v865_v26 = vmul.f32 %v1405_v23, %v864_v25 }
0x178d   :  { %v866_v27 = vadd.f32 %v1405_v23, %v865_v26 }
0x178f   :  { %v870_v30 = vsel %vm869_vm3, %v1405_v23, %v866_v27 }
0x1790   :  { %v875_v33 = vsel %vm872_vm4, %v874_v31, %v870_v30 }
0x1791   :  { %v881_v39 = vmul.f32 %v879_v38, %v875_v33 }
0x17d6   :  { %v884_v32 = vpop.permute.xlu2 %883 }
0x17d7   :  { %v886_v37 = vmul.f32 %v884_v32, %v875_v33 }
0x17d9   :  { %888 = vrot.lane.b32.xlu0 %v886_v37, %s1507_s2 }
0x184b   :  { %v889_v40 = vpop.permute.xlu0 %888 }
0x184c   :  { %v891_v41 = vadd.f32 %v889_v40, %v881_v39 }
0x184e   :  { %1406 = vtanh.f32 %v891_v41  ;;  %v944_v3 = vrot.slane %v891_v41, 6 }
0x1854   :  { %v1407_v42 = vpop.eup %1406 }
0x1855   :  { %894 = vrot.lane.b32.xlu1 %v1407_v42, %s1503_s19 }
0x18c7   :  { %v895_v43 = vpop.permute.xlu1 %894 }
0x18c8   :  { %v897_v44 = vmul.f32 %v895_v43, %v875_v33 }
0x18ca   :  { %v898_v45 = vpack.c.bf16 %v897_v44, %v897_v44 }
0x18cc   :  { %v900_v46 = vrot.slane %v898_v45, 2 }
0x18ce   :  { %901 = vrot.lane.b32.xlu2 %v900_v46, %s1507_s2 }
0x1928   :  { %v902_v47 = vpop.permute.xlu2 %901 }
0x1929   :  { %1293 = vmatmul.msk.bf16.vlgmr.msrb.gmra.mxu1 %vm113_vm6, %v902_v47 }
0x19a6   :  { %v915_v49 = vpop.f32.mrf.mxu1 }
0x19a7   :  { %v920_v50 = vrot.slane %v915_v49, 2 }
0x19a9   :  { %v922_v6 = vadd.f32 %v920_v50, %v1699_v9 }
0x19ab   :  { %1408 = vtanh.f32 %v922_v6  ;;  %v1294_v53 = vmul.f32 -1.442695, %v922_v6 }
0x19ad   :  { %1410 = vpow2.f32 %v1294_v53 }
0x19ae   :  { %v917_v51 = vpop.f32.mrf.mxu1 }
0x19b1   :  { %v1409_v52 = vpop.eup %1408 }
0x19b2   :  { %948 = vrot.lane.b32.xlu0 %v1409_v52, %s1503_s19 }
0x19b3   :  { %v1411_v54 = vpop.eup %1410 }
0x19b4   :  { %v926_v11 = vadd.f32 1.0, %v1411_v54 }
0x19b6   :  { %1412 = vrcp.f32 %v926_v11  ;;  %v938_v58 = vand.u32 2147483648, %v926_v11  ;;  %vm932_vm8 = vweird.f32 %v926_v11  ;;  %v936_v59 = vand.u32 2147483647, %v926_v11 }
0x19b8   :  { %v939_v60 = vor.u32 1.1754944e-38, %v938_v58  ;;  %vm937_vm10 = vcmp.eq.f32.partialorder %v936_v59, 8.507059e+37 }
0x19bc   :  { %v1413_v36 = vpop.eup %1412 }
0x19bd   :  { %v928_v55 = vmul.f32 %v1413_v36, %v926_v11  ;;  %vm933_vm7 = vweird.f32 %v1413_v36 }
0x19be   :  { %vm934_vm9 = vmor %vm932_vm8, %vm933_vm7 }
0x19bf   :  { %v929_v2 = vsub.f32 1.0, %v928_v55 }
0x19c1   :  { %v930_v56 = vmul.f32 %v1413_v36, %v929_v2 }
0x19c3   :  { %v931_v57 = vadd.f32 %v1413_v36, %v930_v56 }
0x19c5   :  { %v935_v9 = vsel %vm934_vm9, %v1413_v36, %v931_v57 }
0x19c6   :  { %v940_v62 = vsel %vm937_vm10, %v939_v60, %v935_v9 }
0x19c7   :  { %v946_v4 = vmul.f32 %v944_v3, %v940_v62 }
0x1a24   :  { %v949_v61 = vpop.permute.xlu0 %948 }
0x1a25   :  { %v951_v63 = vmul.f32 %v949_v61, %v940_v62 }
0x1a27   :  { %953 = vrot.lane.b32.xlu1 %v951_v63, %s1507_s2 }
0x1a99   :  { %v954_v5 = vpop.permute.xlu1 %953 }
0x1a9a   :  { %v956_v1 = vadd.f32 %v954_v5, %v946_v4 }
0x1a9c   :  { %1414 = vtanh.f32 %v956_v1  ;;  %v1006_v32 = vrot.slane %v956_v1, 6 }
0x1aa2   :  { %v1415_v35 = vpop.eup %1414 }
0x1aa3   :  { %959 = vrot.lane.b32.xlu2 %v1415_v35, %s1503_s19 }
0x1afd   :  { %v960_v7 = vpop.permute.xlu2 %959 }
0x1afe   :  { %v962_v10 = vmul.f32 %v960_v7, %v940_v62 }
0x1b00   :  { %v963_v34 = vpack.c.bf16 %v962_v10, %v962_v10 }
0x1b02   :  { %v965_v0 = vrot.slane %v963_v34, 3 }
0x1b04   :  { %966 = vrot.lane.b32.xlu0 %v965_v0, %s1507_s2 }
0x1b76   :  { %v967_v12 = vpop.permute.xlu0 %966 }
0x1b77   :  { %1295 = vmatmul.msk.bf16.vlgmr.msrb.gmra.mxu2 %vm113_vm6, %v967_v12 }
0x1bfa   :  { %v980_v14 = vpop.f32.mrf.mxu2 }
0x1bfb   :  { %v984_v15 = vadd.f32 %v980_v14, %v1726_v13 }
0x1bfd   :  { %1416 = vtanh.f32 %v984_v15  ;;  %v1296_v17 = vmul.f32 -1.442695, %v984_v15 }
0x1bff   :  { %1418 = vpow2.f32 %v1296_v17 }
0x1c02   :  { %v982_v8 = vpop.f32.mrf.mxu2 }
0x1c03   :  { %v1417_v16 = vpop.eup %1416 }
0x1c04   :  { %1010 = vrot.lane.b32.xlu1 %v1417_v16, %s1503_s19 }
0x1c05   :  { %v1419_v18 = vpop.eup %1418 }
0x1c06   :  { %v988_v19 = vadd.f32 1.0, %v1419_v18 }
0x1c08   :  { %1420 = vrcp.f32 %v988_v19  ;;  %v1000_v20 = vand.u32 2147483648, %v988_v19  ;;  %vm994_vm12 = vweird.f32 %v988_v19  ;;  %v998_v26 = vand.u32 2147483647, %v988_v19 }
0x1c0a   :  { %v1001_v28 = vor.u32 1.1754944e-38, %v1000_v20  ;;  %vm999_vm14 = vcmp.eq.f32.partialorder %v998_v26, 8.507059e+37 }
0x1c0e   :  { %v1421_v21 = vpop.eup %1420 }
0x1c0f   :  { %v990_v22 = vmul.f32 %v1421_v21, %v988_v19  ;;  %vm995_vm11 = vweird.f32 %v1421_v21 }
0x1c10   :  { %vm996_vm13 = vmor %vm994_vm12, %vm995_vm11  ;;  %vm1239_vm12 = vcmask 7174  }
0x1c11   :  { %v991_v23 = vsub.f32 1.0, %v990_v22 }
0x1c13   :  { %v992_v24 = vmul.f32 %v1421_v21, %v991_v23 }
0x1c15   :  { %v993_v25 = vadd.f32 %v1421_v21, %v992_v24 }
0x1c17   :  { %v997_v27 = vsel %vm996_vm13, %v1421_v21, %v993_v25 }
0x1c18   :  { %v1002_v30 = vsel %vm999_vm14, %v1001_v28, %v997_v27 }
0x1c19   :  { %v1008_v33 = vmul.f32 %v1006_v32, %v1002_v30 }
0x1c76   :  { %v1011_v29 = vpop.permute.xlu1 %1010 }
0x1c77   :  { %v1013_v31 = vmul.f32 %v1011_v29, %v1002_v30 }
0x1c79   :  { %1015 = vrot.lane.b32.xlu2 %v1013_v31, %s1507_s2 }
0x1cd3   :  { %v1016_v37 = vpop.permute.xlu2 %1015 }
0x1cd4   :  { %v1018_v38 = vadd.f32 %v1016_v37, %v1008_v33 }
0x1cd6   :  { %1422 = vtanh.f32 %v1018_v38  ;;  %v1070_v9 = vrot.slane %v1018_v38, 6 }
0x1cdc   :  { %v1423_v39 = vpop.eup %1422 }
0x1cdd   :  { %1021 = vrot.lane.b32.xlu0 %v1423_v39, %s1503_s19 }
0x1d4f   :  { %v1022_v40 = vpop.permute.xlu0 %1021 }
0x1d50   :  { %v1024_v41 = vmul.f32 %v1022_v40, %v1002_v30 }
0x1d52   :  { %v1025_v42 = vpack.c.bf16 %v1024_v41, %v1024_v41 }
0x1d54   :  { %1027 = vrot.lane.b32.xlu1 %v1025_v42, %s1507_s2 }
0x1dc6   :  { %v1028_v43 = vpop.permute.xlu1 %1027 }
0x1dc7   :  { %1297 = vmatmul.msk.bf16.vlgmr.msrb.gmra.mxu3 %vm113_vm6, %v1028_v43 }
0x1e4a   :  { %v1041_v44 = vpop.f32.mrf.mxu3 }
0x1e4b   :  { %v1046_v45 = vrot.slane %v1041_v44, 6 }
0x1e4d   :  { %v1048_v46 = vadd.f32 %v1046_v45, %v1726_v13 }
0x1e4f   :  { %1424 = vtanh.f32 %v1048_v46  ;;  %v1298_v49 = vmul.f32 -1.442695, %v1048_v46 }
0x1e51   :  { %1426 = vpow2.f32 %v1298_v49 }
0x1e52   :  { %v1043_v47 = vpop.f32.mrf.mxu3 }
0x1e55   :  { %v1425_v48 = vpop.eup %1424 }
0x1e56   :  { %1074 = vrot.lane.b32.xlu2 %v1425_v48, %s1503_s19 }
0x1e57   :  { %v1427_v50 = vpop.eup %1426 }
0x1e58   :  { %v1052_v6 = vadd.f32 1.0, %v1427_v50 }
0x1e5a   :  { %1428 = vrcp.f32 %v1052_v6  ;;  %v1064_v36 = vand.u32 2147483648, %v1052_v6  ;;  %vm1058_vm0 = vweird.f32 %v1052_v6  ;;  %v1062_v55 = vand.u32 2147483647, %v1052_v6 }
0x1e5c   :  { %v1065_v56 = vor.u32 1.1754944e-38, %v1064_v36  ;;  %vm1063_vm2 = vcmp.eq.f32.partialorder %v1062_v55, 8.507059e+37 }
0x1e60   :  { %v1429_v51 = vpop.eup %1428 }
0x1e61   :  { %v1054_v52 = vmul.f32 %v1429_v51, %v1052_v6  ;;  %vm1059_vm15 = vweird.f32 %v1429_v51 }
0x1e62   :  { %vm1060_vm1 = vmor %vm1058_vm0, %vm1059_vm15 }
0x1e63   :  { %v1055_v53 = vsub.f32 1.0, %v1054_v52 }
0x1e65   :  { %v1056_v54 = vmul.f32 %v1429_v51, %v1055_v53 }
0x1e67   :  { %v1057_v11 = vadd.f32 %v1429_v51, %v1056_v54 }
0x1e69   :  { %v1061_v2 = vsel %vm1060_vm1, %v1429_v51, %v1057_v11 }
0x1e6a   :  { %v1066_v58 = vsel %vm1063_vm2, %v1065_v56, %v1061_v2  ;;  %v1318_v56 = vld [vmem:[%s1765_s7] ss:$0 sm:$0xff] }
0x1e6b   :  { %v1072_v60 = vmul.f32 %v1070_v9, %v1066_v58 }
0x1eb0   :  { %v1075_v57 = vpop.permute.xlu2 %1074 }
0x1eb1   :  { %v1077_v59 = vmul.f32 %v1075_v57, %v1066_v58 }
0x1eb3   :  { %1079 = vrot.lane.b32.xlu0 %v1077_v59, %s1507_s2 }
0x1f25   :  { %v1080_v61 = vpop.permute.xlu0 %1079 }
0x1f26   :  { %v1082_v62 = vadd.f32 %v1080_v61, %v1072_v60 }
0x1f28   :  { %1430 = vtanh.f32 %v1082_v62  ;;  %v1135_v28 = vrot.slane %v1082_v62, 6 }
0x1f2e   :  { %v1431_v63 = vpop.eup %1430 }
0x1f2f   :  { %1085 = vrot.lane.b32.xlu1 %v1431_v63, %s1503_s19 }
0x1fa1   :  { %v1086_v3 = vpop.permute.xlu1 %1085 }
0x1fa2   :  { %v1088_v4 = vmul.f32 %v1086_v3, %v1066_v58 }
0x1fa4   :  { %v1089_v5 = vpack.c.bf16 %v1088_v4, %v1088_v4 }
0x1fa6   :  { %v1091_v1 = vrot.slane %v1089_v5, 1 }
0x1fa8   :  { %1092 = vrot.lane.b32.xlu2 %v1091_v1, %s1507_s2  ;;  %v1319_v1 = vld [vmem:[#allocation3] ss:$0 sm:$0xff] }
0x2002   :  { %v1093_v35 = vpop.permute.xlu2 %1092 }
0x2003   :  { %1299 = vmatmul.msk.bf16.vlgmr.msra.gmra.mxu0 %vm113_vm6, %v1093_v35 }
0x2080   :  { %v1106_v7 = vpop.f32.mrf.mxu0 }
0x2081   :  { %v1111_v10 = vrot.slane %v1106_v7, 4 }
0x2083   :  { %v1113_v34 = vadd.f32 %v1111_v10, %v1726_v13 }
0x2085   :  { %1432 = vtanh.f32 %v1113_v34  ;;  %v1300_v14 = vmul.f32 -1.442695, %v1113_v34 }
0x2087   :  { %1434 = vpow2.f32 %v1300_v14 }
0x2088   :  { %v1108_v0 = vpop.f32.mrf.mxu0 }
0x208b   :  { %v1433_v12 = vpop.eup %1432 }
0x208c   :  { %1139 = vrot.lane.b32.xlu0 %v1433_v12, %s1503_s19 }
0x208d   :  { %v1435_v15 = vpop.eup %1434 }
0x208e   :  { %v1117_v8 = vadd.f32 1.0, %v1435_v15 }
0x2090   :  { %1436 = vrcp.f32 %v1117_v8  ;;  %v1129_v22 = vand.u32 2147483648, %v1117_v8  ;;  %vm1123_vm4 = vweird.f32 %v1117_v8  ;;  %v1127_v23 = vand.u32 2147483647, %v1117_v8 }
0x2092   :  { %v1130_v25 = vor.u32 1.1754944e-38, %v1129_v22  ;;  %vm1128_vm8 = vcmp.eq.f32.partialorder %v1127_v23, 8.507059e+37 }
0x2096   :  { %v1437_v16 = vpop.eup %1436 }
0x2097   :  { %v1119_v17 = vmul.f32 %v1437_v16, %v1117_v8  ;;  %vm1124_vm3 = vweird.f32 %v1437_v16 }
0x2098   :  { %vm1125_vm7 = vmor %vm1123_vm4, %vm1124_vm3 }
0x2099   :  { %v1120_v18 = vsub.f32 1.0, %v1119_v17 }
0x209b   :  { %v1121_v19 = vmul.f32 %v1437_v16, %v1120_v18 }
0x209d   :  { %v1122_v21 = vadd.f32 %v1437_v16, %v1121_v19 }
0x209f   :  { %v1126_v24 = vsel %vm1125_vm7, %v1437_v16, %v1122_v21 }
0x20a0   :  { %v1131_v26 = vsel %vm1128_vm8, %v1130_v25, %v1126_v24 }
0x20a1   :  { %v1137_v29 = vmul.f32 %v1135_v28, %v1131_v26 }
0x20fe   :  { %v1140_v20 = vpop.permute.xlu0 %1139 }
0x20ff   :  { %v1142_v27 = vmul.f32 %v1140_v20, %v1131_v26 }
0x2101   :  { %1144 = vrot.lane.b32.xlu1 %v1142_v27, %s1507_s2 }
0x2173   :  { %v1145_v30 = vpop.permute.xlu1 %1144 }
0x2174   :  { %v1147_v31 = vadd.f32 %v1145_v30, %v1137_v29 }
0x2176   :  { %1438 = vtanh.f32 %v1147_v31  ;;  %v1200_v57 = vrot.slane %v1147_v31, 6 }
0x217c   :  { %v1439_v32 = vpop.eup %1438 }
0x217d   :  { %1150 = vrot.lane.b32.xlu2 %v1439_v32, %s1503_s19 }
0x21d7   :  { %v1151_v33 = vpop.permute.xlu2 %1150 }
0x21d8   :  { %v1153_v37 = vmul.f32 %v1151_v33, %v1131_v26 }
0x21da   :  { %v1154_v38 = vpack.c.bf16 %v1153_v37, %v1153_v37 }
0x21dc   :  { %v1156_v39 = vrot.slane %v1154_v38, 2 }
0x21de   :  { %1157 = vrot.lane.b32.xlu0 %v1156_v39, %s1507_s2 }
0x2250   :  { %v1158_v40 = vpop.permute.xlu0 %1157 }
0x2251   :  { %1301 = vmatmul.msk.bf16.vlgmr.msra.gmra.mxu1 %vm113_vm6, %v1158_v40 }
0x22ce   :  { %v1171_v41 = vpop.f32.mrf.mxu1 }
0x22cf   :  { %v1176_v42 = vrot.slane %v1171_v41, 2 }
0x22d1   :  { %v1178_v43 = vadd.f32 %v1176_v42, %v1726_v13 }
0x22d3   :  { %1440 = vtanh.f32 %v1178_v43  ;;  %v1302_v46 = vmul.f32 -1.442695, %v1178_v43 }
0x22d5   :  { %1442 = vpow2.f32 %v1302_v46 }
0x22d6   :  { %v1173_v44 = vpop.f32.mrf.mxu1 }
0x22d9   :  { %v1441_v45 = vpop.eup %1440 }
0x22da   :  { %1204 = vrot.lane.b32.xlu1 %v1441_v45, %s1503_s19 }
0x22db   :  { %v1443_v47 = vpop.eup %1442 }
0x22dc   :  { %v1182_v48 = vadd.f32 1.0, %v1443_v47 }
0x22de   :  { %1444 = vrcp.f32 %v1182_v48  ;;  %v1194_v53 = vand.u32 2147483648, %v1182_v48  ;;  %vm1188_vm9 = vweird.f32 %v1182_v48  ;;  %v1192_v54 = vand.u32 2147483647, %v1182_v48 }
0x22e0   :  { %v1195_v11 = vor.u32 1.1754944e-38, %v1194_v53  ;;  %vm1193_vm11 = vcmp.eq.f32.partialorder %v1192_v54, 8.507059e+37 }
0x22e2   :  { %1223 = vrot.lane.b32.xlu1 %v1318_v56, %s1508_s11 }
0x22e4   :  { %v1445_v49 = vpop.eup %1444 }
0x22e5   :  { %v1184_v50 = vmul.f32 %v1445_v49, %v1182_v48  ;;  %vm1189_vm6 = vweird.f32 %v1445_v49 }
0x22e6   :  { %vm1190_vm10 = vmor %vm1188_vm9, %vm1189_vm6 }
0x22e7   :  { %v1185_v6 = vsub.f32 1.0, %v1184_v50 }
0x22e9   :  { %v1186_v51 = vmul.f32 %v1445_v49, %v1185_v6 }
0x22eb   :  { %v1187_v52 = vadd.f32 %v1445_v49, %v1186_v51 }
0x22ed   :  { %v1191_v13 = vsel %vm1190_vm10, %v1445_v49, %v1187_v52 }
0x22ee   :  { %v1196_v55 = vsel %vm1193_vm11, %v1195_v11, %v1191_v13 }
0x22ef   :  { %v1202_v58 = vmul.f32 %v1200_v57, %v1196_v55 }
0x234c   :  { %v1205_v36 = vpop.permute.xlu1 %1204 }
0x234d   :  { %v1207_v2 = vmul.f32 %v1205_v36, %v1196_v55 }
0x234f   :  { %1209 = vrot.lane.b32.xlu2 %v1207_v2, %s1507_s2 }
0x2354   :  { %v1224_v62 = vpop.permute.xlu1 %1223 }
0x23a9   :  { %v1210_v59 = vpop.permute.xlu2 %1209 }
0x23aa   :  { %v1212_v9 = vadd.f32 %v1210_v59, %v1202_v58 }
0x23ac   :  { %1446 = vtanh.f32 %v1212_v9 }
0x23b2   :  { %v1447_v60 = vpop.eup %1446 }
0x23b3   :  { %1215 = vrot.lane.b32.xlu0 %v1447_v60, %s1503_s19 }
0x2425   :  { %v1216_v61 = vpop.permute.xlu0 %1215 }
0x2426   :  { %v1218_v63 = vmul.f32 %v1216_v61, %v1196_v55 }
0x2428   :  { %v1226_v3 = vmul.f32 %v1224_v62, %v1218_v63 }
0x242a   :  { %1228 = vrot.lane.b32.xlu2 %v1226_v3, %s1507_s2 }
0x2484   :  { %v1229_v4 = vpop.permute.xlu2 %1228 }
0x2485   :  { %v1231_v5 = vsel %vm384_vm5, %v1229_v4, 0.0 }
0x2486   :  { %1232 = vadd.xlane.f32.xlu0 %v1231_v5 }
0x24f9   :  { %v1233_v35 = vpop.xlane.xlu0 %1232 }
0x24fa   :  { %v1237_v7 = vadd.f32 %v1319_v1, %v1233_v35 }
0x24fc   :  { %1448 = vtanh.f32 %v1237_v7 }
0x2502   :  { %v1449_v10 = vpop.eup %1448 }
0x2503   :  { %1240 = vst.msk [vmem:[%s1767_s9 - $0x6] sm:$0xc0] %vm1239_vm12, %v1449_v10 }
0x2504   :  { %1245 = vsyncpa [#allocation5], 1 }
0x2505   :  { %1246 = vsyncpa [#allocation7], 1 }

</bundles_post_ra>
